<compile_context>
chip_gen: v7x
topology: tpu7x:2x2x1
jax: 0.10.0
libtpu: 0.0.40
codegen_flags: <defaults>
</compile_context>

<pallas_src>
import numpy as np

import jax
import jax.numpy as jnp
from jax.experimental import pallas as pl
from jax.experimental.pallas import tpu as pltpu


# ---------------------------------------------------------------------------
# Fused kernel: the whole LeNet5 forward for one batch block of BT images.
#
# Row packing is "spatial index major, image minor": row = spatial * BT + b.
#   x      : (7*BT, 112)  rows (hq, b),  lanes s*28 + w            (row quads)
#   conv1  : (6*BT, 576)  rows (m1, b),  lanes q1*288 + p*144 + c*24 + j
#   pool1  : (6*BT, 144)  rows (m1, b),  lanes q1*72  + c*12  + jj (row pairs)
#   conv2  : (4*BT, 256)  rows (oii, b), lanes p2*128 + co*8  + j2
#   pool2  : (4*BT,  64)  rows (oii, b), lanes co*4 + jj2
#   fc1..3 : (BT, 128)    rows b, zero-padded lanes
# ---------------------------------------------------------------------------
def _lenet5_kernel(x_ref, w1_ref, b1_ref, se1_ref, so1_ref,
                   w2_ref, b2_ref, se2_ref, so2_ref,
                   w3_ref, b3_ref, w4_ref, b4_ref, w5_ref, b5_ref,
                   out_ref, cnt_ref):
    f32 = jnp.float32
    BT = out_ref.shape[0]          # images in this batch block
    cdt = w1_ref.dtype             # MXU operand dtype (bf16), accumulate f32

    def layer(a, w_ref, b_ref):    # fused conv/fc layer: one matmul + bias + relu
        z = jnp.dot(a.astype(cdt), w_ref[...], preferred_element_type=f32)
        return jnp.maximum(z + b_ref[...], 0.0)

    def sel(a, s_ref):             # exact 0/1 lane-selection matmul (f32)
        return jnp.dot(a, s_ref[...], preferred_element_type=f32)

    def nnz(a):                    # count_ones == number of nonzero elements
        return jnp.sum((a != 0.0).astype(jnp.int32))

    # -- input (+ count y1) ---------------------------------------------------
    x = x_ref[...]                                                # (7*BT, 112)
    c1 = nnz(x)

    # -- conv1 + relu1: one K=224 dot, both pool-row parities on lanes --------
    l1 = jnp.concatenate([x[0:6 * BT, :], x[BT:7 * BT, :]], axis=-1)
    a1 = layer(l1, w1_ref, b1_ref)                                # (6*BT, 576)

    # -- pool1: vertical max via lane slices (VPU), horizontal via 0/1 dots ---
    v1 = jnp.concatenate(
        [jnp.maximum(a1[:, 0:144], a1[:, 144:288]),
         jnp.maximum(a1[:, 288:432], a1[:, 432:576])], axis=-1)   # (6*BT, 288)
    p1 = jnp.maximum(sel(v1, se1_ref), sel(v1, so1_ref))          # (6*BT, 144)
    c2 = nnz(p1)

    # -- conv2 + relu2: one K=432 dot (contiguous row-pair slices, no RS) -----
    l2 = jnp.concatenate([p1[t * BT:(t + 4) * BT, :] for t in range(3)],
                         axis=-1)                                 # (4*BT, 432)
    a2 = layer(l2, w2_ref, b2_ref)                                # (4*BT, 256)

    # -- pool2 -----------------------------------------------------------------
    v2 = jnp.maximum(a2[:, 0:128], a2[:, 128:256])                # (4*BT, 128)
    p2 = jnp.maximum(sel(v2, se2_ref), sel(v2, so2_ref))          # (4*BT, 64)
    c3 = nnz(p2)

    # -- fc1 + relu3 (torch flatten order baked into w3, no gather matmuls) ---
    l3 = jnp.concatenate([p2[h * BT:(h + 1) * BT, :] for h in range(4)],
                         axis=-1)                                 # (BT, 256)
    z3 = layer(l3, w3_ref, b3_ref)                  # (BT, 128), lanes >= 120 stay 0
    c4 = nnz(z3)

    # -- fc2 + relu4 -----------------------------------------------------------
    z4 = layer(z3, w4_ref, b4_ref)                  # lanes >= 84 stay 0
    c5 = nnz(z4)

    # -- fc3 + relu5 -----------------------------------------------------------
    z5 = layer(z4, w5_ref, b5_ref)                  # lanes >= 10 stay 0

    out_ref[...] = z5
    # TODO(synk): the five nnz reductions could be kept as per-lane partials and
    # reduced once at the end; at these sizes they are negligible VPU filler.
    cnt_ref[0, 0] = c1 + c2 + c3 + c4 + c5


# ---------------------------------------------------------------------------
# One-time weight re-packing (done at init).  All constants are independent of
# the batch size (no O(B^2) selectors), so the same pack works for any tiling.
# ---------------------------------------------------------------------------
def prepare_inputs(params, matmul_dtype=jnp.bfloat16):
    f32 = np.float32
    w1 = np.asarray(params["conv1_w"], f32)   # (6, 1, 5, 5)
    b1 = np.asarray(params["conv1_b"], f32)
    w2 = np.asarray(params["conv2_w"], f32)   # (16, 6, 5, 5)
    b2 = np.asarray(params["conv2_b"], f32)
    fw1 = np.asarray(params["fc1_w"], f32)    # (120, 256)
    fb1 = np.asarray(params["fc1_b"], f32)
    fw2 = np.asarray(params["fc2_w"], f32)    # (84, 120)
    fb2 = np.asarray(params["fc2_b"], f32)
    fw3 = np.asarray(params["fc3_w"], f32)    # (10, 84)
    fb3 = np.asarray(params["fc3_b"], f32)

    # conv1: LHS lanes (mo, s, w) hold x row 4*m1 + 4*mo + s;
    # output lanes (q1, p, c, j) are conv1[spatial row 4*m1 + 2*q1 + p, col j].
    W1 = np.zeros((224, 576), f32)
    for mo in range(2):
        for s in range(4):
            rho = 4 * mo + s
            for q1 in range(2):
                for p in range(2):
                    kh = rho - (2 * q1 + p)
                    if not 0 <= kh <= 4:
                        continue
                    for c in range(6):
                        for kw in range(5):
                            for j in range(24):
                                W1[mo * 112 + s * 28 + j + kw,
                                   q1 * 288 + p * 144 + c * 24 + j] = w1[c, 0, kh, kw]
    B1 = np.zeros((1, 576), f32)
    for q1 in range(2):
        for p in range(2):
            for c in range(6):
                base = q1 * 288 + p * 144 + c * 24
                B1[0, base:base + 24] = b1[c]

    # pool1 horizontal selectors (even / odd column within each (q1, c) block)
    SE1 = np.zeros((288, 144), f32)
    SO1 = np.zeros((288, 144), f32)
    for q1 in range(2):
        for c in range(6):
            for jj in range(12):
                SE1[q1 * 144 + c * 24 + 2 * jj, q1 * 72 + c * 12 + jj] = 1.0
                SO1[q1 * 144 + c * 24 + 2 * jj + 1, q1 * 72 + c * 12 + jj] = 1.0

    # conv2: LHS lanes (t, q1, ci, jj) hold pool1 row 2*oii + 2*t + q1;
    # output lanes (p2, co, j2) are conv2[spatial row 2*oii + p2, col j2].
    W2 = np.zeros((432, 256), f32)
    for t in range(3):
        for q1 in range(2):
            rho = 2 * t + q1
            for p2 in range(2):
                kh = rho - p2
                if not 0 <= kh <= 4:
                    continue
                for co in range(16):
                    for ci in range(6):
                        for kw in range(5):
                            for j2 in range(8):
                                W2[t * 144 + q1 * 72 + ci * 12 + j2 + kw,
                                   p2 * 128 + co * 8 + j2] = w2[co, ci, kh, kw]
    B2 = np.zeros((1, 256), f32)
    for p2 in range(2):
        for co in range(16):
            base = p2 * 128 + co * 8
            B2[0, base:base + 8] = b2[co]

    # pool2 horizontal selectors
    SE2 = np.zeros((128, 64), f32)
    SO2 = np.zeros((128, 64), f32)
    for co in range(16):
        for jj in range(4):
            SE2[co * 8 + 2 * jj, co * 4 + jj] = 1.0
            SO2[co * 8 + 2 * jj + 1, co * 4 + jj] = 1.0

    # fc1: kernel LHS lane is h*64 + co*4 + w; torch flatten index co*16 + h*4 + w.
    W3 = np.zeros((256, 128), f32)
    for h in range(4):
        for c in range(16):
            for w in range(4):
                W3[h * 64 + c * 4 + w, :120] = fw1[:, c * 16 + h * 4 + w]
    B3 = np.zeros((1, 128), f32)
    B3[0, :120] = fb1

    # fc2 / fc3: pre-transposed, zero-padded to (128, 128).  Padded columns and
    # biases are exactly 0 so padded activation lanes stay 0 (counts rely on it).
    W4 = np.zeros((128, 128), f32)
    W4[:120, :84] = fw2.T
    B4 = np.zeros((1, 128), f32)
    B4[0, :84] = fb2
    W5 = np.zeros((128, 128), f32)
    W5[:84, :10] = fw3.T
    B5 = np.zeros((1, 128), f32)
    B5[0, :10] = fb3

    def mm(a):   # MXU operand (bf16 by default)
        return jnp.asarray(a, matmul_dtype)

    def vp(a):   # exact / VPU-side constant stays f32
        return jnp.asarray(a, jnp.float32)

    return (mm(W1), vp(B1), vp(SE1), vp(SO1),
            mm(W2), vp(B2), vp(SE2), vp(SO2),
            mm(W3), vp(B3), mm(W4), vp(B4), mm(W5), vp(B5))


# ---------------------------------------------------------------------------
# Forward wrapper: ONE pallas_call, batch grid with parallel semantics.
# ---------------------------------------------------------------------------
def lenet5_forward(prepped, x, block_b=None):
    """x: (B, 1, 28, 28) float32.  Returns (logits (B, 10), activation count)."""
    B = x.shape[0]
    assert x.shape[1:] == (1, 28, 28), "fc1(256) forces 1x28x28 (MNIST) inputs"
    BT = B if block_b is None else block_b
    assert B % BT == 0 and (BT == B or BT % 8 == 0), \
        "batch block must divide B and be a multiple of 8 (or the full batch)"
    G = B // BT

    # Host-side (XLA) re-layout: squeeze the channel dim and fold row-quads
    # onto lanes; rows are ordered (block, quad, image-in-block).
    xq = (x.reshape(G, BT, 7, 4, 28)
           .transpose(0, 2, 1, 3, 4)
           .reshape(G * 7 * BT, 112))

    def resident(a):     # index-invariant -> weights stay VMEM resident
        return pl.BlockSpec(a.shape, lambda g: (0,) * a.ndim)

    logits_pad, cnt = pl.pallas_call(
        _lenet5_kernel,
        grid=(G,),
        out_shape=(jax.ShapeDtypeStruct((B, 128), jnp.float32),
                   jax.ShapeDtypeStruct((G, 1), jnp.int32)),
        in_specs=[pl.BlockSpec((7 * BT, 112), lambda g: (g, 0))]
                 + [resident(a) for a in prepped],
        out_specs=(pl.BlockSpec((BT, 128), lambda g: (g, 0)),
                   pl.BlockSpec((1, 1), lambda g: (g, 0),
                                memory_space=pltpu.MemorySpace.SMEM)),
        compiler_params=pltpu.CompilerParams(
            dimension_semantics=("parallel",)),
    )(xq, *prepped)
    return logits_pad[:, :10], jnp.sum(cnt)


# ---------------------------------------------------------------------------
# Parameters + pure-JAX reference (for validation)
# ---------------------------------------------------------------------------
def init_params(key):
    ks = jax.random.split(key, 10)
    n = jax.random.normal
    return {
        "conv1_w": 0.1 * n(ks[0], (6, 1, 5, 5), jnp.float32),
        "conv1_b": 0.1 * n(ks[1], (6,), jnp.float32),
        "conv2_w": 0.1 * n(ks[2], (16, 6, 5, 5), jnp.float32),
        "conv2_b": 0.1 * n(ks[3], (16,), jnp.float32),
        "fc1_w": 0.1 * n(ks[4], (120, 256), jnp.float32),
        "fc1_b": 0.1 * n(ks[5], (120,), jnp.float32),
        "fc2_w": 0.1 * n(ks[6], (84, 120), jnp.float32),
        "fc2_b": 0.1 * n(ks[7], (84,), jnp.float32),
        "fc3_w": 0.1 * n(ks[8], (10, 84), jnp.float32),
        "fc3_b": 0.1 * n(ks[9], (10,), jnp.float32),
    }


def lenet5_reference(params, x):
    hi = jax.lax.Precision.HIGHEST

    def count(v):
        return jnp.sum((v != 0).astype(jnp.int32))

    y1 = count(x)
    z = jax.lax.conv_general_dilated(
        x, params["conv1_w"], (1, 1), "VALID",
        dimension_numbers=("NCHW", "OIHW", "NCHW"), precision=hi)
    z = jnp.maximum(z + params["conv1_b"][None, :, None, None], 0.0)
    z = jax.lax.reduce_window(z, -jnp.inf, jax.lax.max,
                              (1, 1, 2, 2), (1, 1, 2, 2), "VALID")
    y2 = count(z)
    z = jax.lax.conv_general_dilated(
        z, params["conv2_w"], (1, 1), "VALID",
        dimension_numbers=("NCHW", "OIHW", "NCHW"), precision=hi)
    z = jnp.maximum(z + params["conv2_b"][None, :, None, None], 0.0)
    z = jax.lax.reduce_window(z, -jnp.inf, jax.lax.max,
                              (1, 1, 2, 2), (1, 1, 2, 2), "VALID")
    z = z.reshape(z.shape[0], -1)
    y3 = count(z)
    z = jnp.maximum(jnp.dot(z, params["fc1_w"].T, precision=hi) + params["fc1_b"], 0.0)
    y4 = count(z)
    z = jnp.maximum(jnp.dot(z, params["fc2_w"].T, precision=hi) + params["fc2_b"], 0.0)
    y5 = count(z)
    z = jnp.maximum(jnp.dot(z, params["fc3_w"].T, precision=hi) + params["fc3_b"], 0.0)
    return z, y1 + y2 + y3 + y4 + y5


# ---------------------------------------------------------------------------

if __name__ == "__main__":
    key = jax.random.PRNGKey(0)
    k_param, k_x = jax.random.split(key)
    params = init_params(k_param)

    B = 2
    # fc1 expects 256 = 16*4*4 inputs, which forces 28x28 (MNIST) spatial input.
    x = jax.random.normal(k_x, (B, 1, 28, 28), jnp.float32)

    prepped = prepare_inputs(params)            # one-time weight re-packing
    fwd = jax.jit(lenet5_forward)
    logits, y = fwd(prepped, x)
    jax.block_until_ready((logits, y))
    assert logits.shape == (B, 10)

    # Correctness check against a pure-JAX (high-precision) reference.
    # bf16 MXU operands (per the perf review) widen the tolerances slightly;
    # the activation count can drift by a few borderline ReLU sign flips.
    ref_logits, ref_y = lenet5_reference(params, x)
    np.testing.assert_allclose(np.asarray(logits), np.asarray(ref_logits),
                               rtol=2e-2, atol=2e-2)
    assert abs(int(y) - int(ref_y)) <= 32, (int(y), int(ref_y))

    print("KERNEL_OK")
</pallas_src>

<mosaic_0001>
module attributes {stable_mosaic.version = 11 : i64} {
  func.func @_lenet5_kernel(%arg0: i32, %arg1: memref<14x112xf32, #tpu.memory_space<vmem>>, %arg2: memref<224x576xbf16, #tpu.memory_space<vmem>>, %arg3: memref<1x576xf32, #tpu.memory_space<vmem>>, %arg4: memref<288x144xf32, #tpu.memory_space<vmem>>, %arg5: memref<288x144xf32, #tpu.memory_space<vmem>>, %arg6: memref<432x256xbf16, #tpu.memory_space<vmem>>, %arg7: memref<1x256xf32, #tpu.memory_space<vmem>>, %arg8: memref<128x64xf32, #tpu.memory_space<vmem>>, %arg9: memref<128x64xf32, #tpu.memory_space<vmem>>, %arg10: memref<256x128xbf16, #tpu.memory_space<vmem>>, %arg11: memref<1x128xf32, #tpu.memory_space<vmem>>, %arg12: memref<128x128xbf16, #tpu.memory_space<vmem>>, %arg13: memref<1x128xf32, #tpu.memory_space<vmem>>, %arg14: memref<128x128xbf16, #tpu.memory_space<vmem>>, %arg15: memref<1x128xf32, #tpu.memory_space<vmem>>, %arg16: memref<2x128xf32, #tpu.memory_space<vmem>>, %arg17: memref<1x1xi32, #tpu.memory_space<smem>>) attributes {dimension_semantics = [#tpu.dimension_semantics<parallel>], iteration_bounds = array<i64: 1>, scalar_prefetch = 0 : i64, scratch_operands = 0 : i64, tpu.core_type = #tpu.core_type<tc>, window_params = [{transform_indices = @transform_0, window_bounds = array<i64: 14, 112>}, {pipeline_mode = #tpu.pipeline_mode<synchronous>, transform_indices = @transform_1, window_bounds = array<i64: 224, 576>}, {pipeline_mode = #tpu.pipeline_mode<synchronous>, transform_indices = @transform_2, window_bounds = array<i64: 1, 576>}, {pipeline_mode = #tpu.pipeline_mode<synchronous>, transform_indices = @transform_3, window_bounds = array<i64: 288, 144>}, {pipeline_mode = #tpu.pipeline_mode<synchronous>, transform_indices = @transform_4, window_bounds = array<i64: 288, 144>}, {pipeline_mode = #tpu.pipeline_mode<synchronous>, transform_indices = @transform_5, window_bounds = array<i64: 432, 256>}, {pipeline_mode = #tpu.pipeline_mode<synchronous>, transform_indices = @transform_6, window_bounds = array<i64: 1, 256>}, {pipeline_mode = #tpu.pipeline_mode<synchronous>, transform_indices = @transform_7, window_bounds = array<i64: 128, 64>}, {pipeline_mode = #tpu.pipeline_mode<synchronous>, transform_indices = @transform_8, window_bounds = array<i64: 128, 64>}, {pipeline_mode = #tpu.pipeline_mode<synchronous>, transform_indices = @transform_9, window_bounds = array<i64: 256, 128>}, {pipeline_mode = #tpu.pipeline_mode<synchronous>, transform_indices = @transform_10, window_bounds = array<i64: 1, 128>}, {pipeline_mode = #tpu.pipeline_mode<synchronous>, transform_indices = @transform_11, window_bounds = array<i64: 128, 128>}, {pipeline_mode = #tpu.pipeline_mode<synchronous>, transform_indices = @transform_12, window_bounds = array<i64: 1, 128>}, {pipeline_mode = #tpu.pipeline_mode<synchronous>, transform_indices = @transform_13, window_bounds = array<i64: 128, 128>}, {pipeline_mode = #tpu.pipeline_mode<synchronous>, transform_indices = @transform_14, window_bounds = array<i64: 1, 128>}, {transform_indices = @transform_15, window_bounds = array<i64: 2, 128>}, {transform_indices = @transform_16, window_bounds = array<i64: 1, 1>}]} {
    %c0 = arith.constant 0 : index
    %c0_0 = arith.constant 0 : index
    %0 = vector.load %arg1[%c0, %c0_0] : memref<14x112xf32, #tpu.memory_space<vmem>>, vector<14x112xf32>
    %cst = arith.constant 0.000000e+00 : f32
    %1 = vector.broadcast %cst : f32 to vector<14x112xf32>
    %2 = arith.cmpf one, %0, %1 : vector<14x112xf32>
    %3 = arith.extui %2 : vector<14x112xi1> to vector<14x112xi32>
    %4 = vector.shape_cast %3 : vector<14x112xi32> to vector<1x14x112xi32>
    %cst_1 = arith.constant dense<0> : vector<1xi32>
    %5 = vector.multi_reduction <add>, %4, %cst_1 [1, 2] : vector<1x14x112xi32> to vector<1xi32>
    %6 = vector.shape_cast %5 : vector<1xi32> to vector<1x1x1xi32>
    %7 = vector.extract %6[0, 0, 0] : i32 from vector<1x1x1xi32>
    %8 = vector.extract_strided_slice %0 {offsets = [0, 0], sizes = [12, 112], strides = [1, 1]} : vector<14x112xf32> to vector<12x112xf32>
    %9 = vector.extract_strided_slice %0 {offsets = [2, 0], sizes = [12, 112], strides = [1, 1]} : vector<14x112xf32> to vector<12x112xf32>
    %10 = tpu.concatenate %8, %9 in 1 : vector<12x112xf32>, vector<12x112xf32> -> vector<12x224xf32>
    %11 = arith.truncf %10 : vector<12x224xf32> to vector<12x224xbf16>
    %c0_2 = arith.constant 0 : index
    %c0_3 = arith.constant 0 : index
    %12 = vector.load %arg2[%c0_2, %c0_3] : memref<224x576xbf16, #tpu.memory_space<vmem>>, vector<224x576xbf16>
    %cst_4 = arith.constant dense<0.000000e+00> : vector<12x576xf32>
    %13 = tpu.matmul %11, %12, %cst_4 {dimension_numbers = #tpu.dot_dimension_numbers<[1], [0], [0], [1], [0, 0, 1, 1], [], []>} : vector<12x224xbf16>, vector<224x576xbf16>, vector<12x576xf32> -> vector<12x576xf32>
    %c0_5 = arith.constant 0 : index
    %c0_6 = arith.constant 0 : index
    %14 = vector.load %arg3[%c0_5, %c0_6] : memref<1x576xf32, #tpu.memory_space<vmem>>, vector<1x576xf32>
    %15 = vector.broadcast %14 : vector<1x576xf32> to vector<12x576xf32>
    %16 = arith.addf %13, %15 : vector<12x576xf32>
    %cst_7 = arith.constant 0.000000e+00 : f32
    %17 = vector.broadcast %cst_7 : f32 to vector<12x576xf32>
    %18 = arith.maximumf %16, %17 : vector<12x576xf32>
    %19 = vector.extract_strided_slice %18 {offsets = [0, 0], sizes = [12, 144], strides = [1, 1]} : vector<12x576xf32> to vector<12x144xf32>
    %20 = vector.extract_strided_slice %18 {offsets = [0, 144], sizes = [12, 144], strides = [1, 1]} : vector<12x576xf32> to vector<12x144xf32>
    %21 = arith.maximumf %19, %20 : vector<12x144xf32>
    %22 = vector.extract_strided_slice %18 {offsets = [0, 288], sizes = [12, 144], strides = [1, 1]} : vector<12x576xf32> to vector<12x144xf32>
    %23 = vector.extract_strided_slice %18 {offsets = [0, 432], sizes = [12, 144], strides = [1, 1]} : vector<12x576xf32> to vector<12x144xf32>
    %24 = arith.maximumf %22, %23 : vector<12x144xf32>
    %25 = tpu.concatenate %21, %24 in 1 : vector<12x144xf32>, vector<12x144xf32> -> vector<12x288xf32>
    %c0_8 = arith.constant 0 : index
    %c0_9 = arith.constant 0 : index
    %26 = vector.load %arg4[%c0_8, %c0_9] : memref<288x144xf32, #tpu.memory_space<vmem>>, vector<288x144xf32>
    %cst_10 = arith.constant dense<0.000000e+00> : vector<12x144xf32>
    %27 = tpu.matmul %25, %26, %cst_10 {dimension_numbers = #tpu.dot_dimension_numbers<[1], [0], [0], [1], [0, 0, 1, 1], [], []>} : vector<12x288xf32>, vector<288x144xf32>, vector<12x144xf32> -> vector<12x144xf32>
    %c0_11 = arith.constant 0 : index
    %c0_12 = arith.constant 0 : index
    %28 = vector.load %arg5[%c0_11, %c0_12] : memref<288x144xf32, #tpu.memory_space<vmem>>, vector<288x144xf32>
    %cst_13 = arith.constant dense<0.000000e+00> : vector<12x144xf32>
    %29 = tpu.matmul %25, %28, %cst_13 {dimension_numbers = #tpu.dot_dimension_numbers<[1], [0], [0], [1], [0, 0, 1, 1], [], []>} : vector<12x288xf32>, vector<288x144xf32>, vector<12x144xf32> -> vector<12x144xf32>
    %30 = arith.maximumf %27, %29 : vector<12x144xf32>
    %cst_14 = arith.constant 0.000000e+00 : f32
    %31 = vector.broadcast %cst_14 : f32 to vector<12x144xf32>
    %32 = arith.cmpf one, %30, %31 : vector<12x144xf32>
    %33 = arith.extui %32 : vector<12x144xi1> to vector<12x144xi32>
    %34 = vector.shape_cast %33 : vector<12x144xi32> to vector<1x12x144xi32>
    %cst_15 = arith.constant dense<0> : vector<1xi32>
    %35 = vector.multi_reduction <add>, %34, %cst_15 [1, 2] : vector<1x12x144xi32> to vector<1xi32>
    %36 = vector.shape_cast %35 : vector<1xi32> to vector<1x1x1xi32>
    %37 = vector.extract %36[0, 0, 0] : i32 from vector<1x1x1xi32>
    %38 = vector.extract_strided_slice %30 {offsets = [0, 0], sizes = [8, 144], strides = [1, 1]} : vector<12x144xf32> to vector<8x144xf32>
    %39 = vector.extract_strided_slice %30 {offsets = [2, 0], sizes = [8, 144], strides = [1, 1]} : vector<12x144xf32> to vector<8x144xf32>
    %40 = vector.extract_strided_slice %30 {offsets = [4, 0], sizes = [8, 144], strides = [1, 1]} : vector<12x144xf32> to vector<8x144xf32>
    %41 = tpu.concatenate %38, %39, %40 in 1 : vector<8x144xf32>, vector<8x144xf32>, vector<8x144xf32> -> vector<8x432xf32>
    %42 = arith.truncf %41 : vector<8x432xf32> to vector<8x432xbf16>
    %c0_16 = arith.constant 0 : index
    %c0_17 = arith.constant 0 : index
    %43 = vector.load %arg6[%c0_16, %c0_17] : memref<432x256xbf16, #tpu.memory_space<vmem>>, vector<432x256xbf16>
    %cst_18 = arith.constant dense<0.000000e+00> : vector<8x256xf32>
    %44 = tpu.matmul %42, %43, %cst_18 {dimension_numbers = #tpu.dot_dimension_numbers<[1], [0], [0], [1], [0, 0, 1, 1], [], []>} : vector<8x432xbf16>, vector<432x256xbf16>, vector<8x256xf32> -> vector<8x256xf32>
    %c0_19 = arith.constant 0 : index
    %c0_20 = arith.constant 0 : index
    %45 = vector.load %arg7[%c0_19, %c0_20] : memref<1x256xf32, #tpu.memory_space<vmem>>, vector<1x256xf32>
    %46 = vector.broadcast %45 : vector<1x256xf32> to vector<8x256xf32>
    %47 = arith.addf %44, %46 : vector<8x256xf32>
    %cst_21 = arith.constant 0.000000e+00 : f32
    %48 = vector.broadcast %cst_21 : f32 to vector<8x256xf32>
    %49 = arith.maximumf %47, %48 : vector<8x256xf32>
    %50 = vector.extract_strided_slice %49 {offsets = [0, 0], sizes = [8, 128], strides = [1, 1]} : vector<8x256xf32> to vector<8x128xf32>
    %51 = vector.extract_strided_slice %49 {offsets = [0, 128], sizes = [8, 128], strides = [1, 1]} : vector<8x256xf32> to vector<8x128xf32>
    %52 = arith.maximumf %50, %51 : vector<8x128xf32>
    %c0_22 = arith.constant 0 : index
    %c0_23 = arith.constant 0 : index
    %53 = vector.load %arg8[%c0_22, %c0_23] : memref<128x64xf32, #tpu.memory_space<vmem>>, vector<128x64xf32>
    %cst_24 = arith.constant dense<0.000000e+00> : vector<8x64xf32>
    %54 = tpu.matmul %52, %53, %cst_24 {dimension_numbers = #tpu.dot_dimension_numbers<[1], [0], [0], [1], [0, 0, 1, 1], [], []>} : vector<8x128xf32>, vector<128x64xf32>, vector<8x64xf32> -> vector<8x64xf32>
    %c0_25 = arith.constant 0 : index
    %c0_26 = arith.constant 0 : index
    %55 = vector.load %arg9[%c0_25, %c0_26] : memref<128x64xf32, #tpu.memory_space<vmem>>, vector<128x64xf32>
    %cst_27 = arith.constant dense<0.000000e+00> : vector<8x64xf32>
    %56 = tpu.matmul %52, %55, %cst_27 {dimension_numbers = #tpu.dot_dimension_numbers<[1], [0], [0], [1], [0, 0, 1, 1], [], []>} : vector<8x128xf32>, vector<128x64xf32>, vector<8x64xf32> -> vector<8x64xf32>
    %57 = arith.maximumf %54, %56 : vector<8x64xf32>
    %cst_28 = arith.constant 0.000000e+00 : f32
    %58 = vector.broadcast %cst_28 : f32 to vector<8x64xf32>
    %59 = arith.cmpf one, %57, %58 : vector<8x64xf32>
    %60 = arith.extui %59 : vector<8x64xi1> to vector<8x64xi32>
    %61 = vector.shape_cast %60 : vector<8x64xi32> to vector<1x8x64xi32>
    %cst_29 = arith.constant dense<0> : vector<1xi32>
    %62 = vector.multi_reduction <add>, %61, %cst_29 [1, 2] : vector<1x8x64xi32> to vector<1xi32>
    %63 = vector.shape_cast %62 : vector<1xi32> to vector<1x1x1xi32>
    %64 = vector.extract %63[0, 0, 0] : i32 from vector<1x1x1xi32>
    %65 = vector.extract_strided_slice %57 {offsets = [0, 0], sizes = [2, 64], strides = [1, 1]} : vector<8x64xf32> to vector<2x64xf32>
    %66 = vector.extract_strided_slice %57 {offsets = [2, 0], sizes = [2, 64], strides = [1, 1]} : vector<8x64xf32> to vector<2x64xf32>
    %67 = vector.extract_strided_slice %57 {offsets = [4, 0], sizes = [2, 64], strides = [1, 1]} : vector<8x64xf32> to vector<2x64xf32>
    %68 = vector.extract_strided_slice %57 {offsets = [6, 0], sizes = [2, 64], strides = [1, 1]} : vector<8x64xf32> to vector<2x64xf32>
    %69 = tpu.concatenate %65, %66, %67, %68 in 1 : vector<2x64xf32>, vector<2x64xf32>, vector<2x64xf32>, vector<2x64xf32> -> vector<2x256xf32>
    %70 = arith.truncf %69 : vector<2x256xf32> to vector<2x256xbf16>
    %c0_30 = arith.constant 0 : index
    %c0_31 = arith.constant 0 : index
    %71 = vector.load %arg10[%c0_30, %c0_31] : memref<256x128xbf16, #tpu.memory_space<vmem>>, vector<256x128xbf16>
    %cst_32 = arith.constant dense<0.000000e+00> : vector<2x128xf32>
    %72 = tpu.matmul %70, %71, %cst_32 {dimension_numbers = #tpu.dot_dimension_numbers<[1], [0], [0], [1], [0, 0, 1, 1], [], []>} : vector<2x256xbf16>, vector<256x128xbf16>, vector<2x128xf32> -> vector<2x128xf32>
    %c0_33 = arith.constant 0 : index
    %c0_34 = arith.constant 0 : index
    %73 = vector.load %arg11[%c0_33, %c0_34] : memref<1x128xf32, #tpu.memory_space<vmem>>, vector<1x128xf32>
    %74 = vector.broadcast %73 : vector<1x128xf32> to vector<2x128xf32>
    %75 = arith.addf %72, %74 : vector<2x128xf32>
    %cst_35 = arith.constant 0.000000e+00 : f32
    %76 = vector.broadcast %cst_35 : f32 to vector<2x128xf32>
    %77 = arith.maximumf %75, %76 : vector<2x128xf32>
    %cst_36 = arith.constant 0.000000e+00 : f32
    %78 = vector.broadcast %cst_36 : f32 to vector<2x128xf32>
    %79 = arith.cmpf one, %77, %78 : vector<2x128xf32>
    %80 = arith.extui %79 : vector<2x128xi1> to vector<2x128xi32>
    %81 = vector.shape_cast %80 : vector<2x128xi32> to vector<1x2x128xi32>
    %cst_37 = arith.constant dense<0> : vector<1xi32>
    %82 = vector.multi_reduction <add>, %81, %cst_37 [1, 2] : vector<1x2x128xi32> to vector<1xi32>
    %83 = vector.shape_cast %82 : vector<1xi32> to vector<1x1x1xi32>
    %84 = vector.extract %83[0, 0, 0] : i32 from vector<1x1x1xi32>
    %85 = arith.truncf %77 : vector<2x128xf32> to vector<2x128xbf16>
    %c0_38 = arith.constant 0 : index
    %c0_39 = arith.constant 0 : index
    %86 = vector.load %arg12[%c0_38, %c0_39] : memref<128x128xbf16, #tpu.memory_space<vmem>>, vector<128x128xbf16>
    %cst_40 = arith.constant dense<0.000000e+00> : vector<2x128xf32>
    %87 = tpu.matmul %85, %86, %cst_40 {dimension_numbers = #tpu.dot_dimension_numbers<[1], [0], [0], [1], [0, 0, 1, 1], [], []>} : vector<2x128xbf16>, vector<128x128xbf16>, vector<2x128xf32> -> vector<2x128xf32>
    %c0_41 = arith.constant 0 : index
    %c0_42 = arith.constant 0 : index
    %88 = vector.load %arg13[%c0_41, %c0_42] : memref<1x128xf32, #tpu.memory_space<vmem>>, vector<1x128xf32>
    %89 = vector.broadcast %88 : vector<1x128xf32> to vector<2x128xf32>
    %90 = arith.addf %87, %89 : vector<2x128xf32>
    %cst_43 = arith.constant 0.000000e+00 : f32
    %91 = vector.broadcast %cst_43 : f32 to vector<2x128xf32>
    %92 = arith.maximumf %90, %91 : vector<2x128xf32>
    %cst_44 = arith.constant 0.000000e+00 : f32
    %93 = vector.broadcast %cst_44 : f32 to vector<2x128xf32>
    %94 = arith.cmpf one, %92, %93 : vector<2x128xf32>
    %95 = arith.extui %94 : vector<2x128xi1> to vector<2x128xi32>
    %96 = vector.shape_cast %95 : vector<2x128xi32> to vector<1x2x128xi32>
    %cst_45 = arith.constant dense<0> : vector<1xi32>
    %97 = vector.multi_reduction <add>, %96, %cst_45 [1, 2] : vector<1x2x128xi32> to vector<1xi32>
    %98 = vector.shape_cast %97 : vector<1xi32> to vector<1x1x1xi32>
    %99 = vector.extract %98[0, 0, 0] : i32 from vector<1x1x1xi32>
    %100 = arith.truncf %92 : vector<2x128xf32> to vector<2x128xbf16>
    %c0_46 = arith.constant 0 : index
    %c0_47 = arith.constant 0 : index
    %101 = vector.load %arg14[%c0_46, %c0_47] : memref<128x128xbf16, #tpu.memory_space<vmem>>, vector<128x128xbf16>
    %cst_48 = arith.constant dense<0.000000e+00> : vector<2x128xf32>
    %102 = tpu.matmul %100, %101, %cst_48 {dimension_numbers = #tpu.dot_dimension_numbers<[1], [0], [0], [1], [0, 0, 1, 1], [], []>} : vector<2x128xbf16>, vector<128x128xbf16>, vector<2x128xf32> -> vector<2x128xf32>
    %c0_49 = arith.constant 0 : index
    %c0_50 = arith.constant 0 : index
    %103 = vector.load %arg15[%c0_49, %c0_50] : memref<1x128xf32, #tpu.memory_space<vmem>>, vector<1x128xf32>
    %104 = vector.broadcast %103 : vector<1x128xf32> to vector<2x128xf32>
    %105 = arith.addf %102, %104 : vector<2x128xf32>
    %cst_51 = arith.constant 0.000000e+00 : f32
    %106 = vector.broadcast %cst_51 : f32 to vector<2x128xf32>
    %107 = arith.maximumf %105, %106 : vector<2x128xf32>
    %c0_52 = arith.constant 0 : index
    %c0_53 = arith.constant 0 : index
    %108 = vector.load %arg16[%c0_52, %c0_53] : memref<2x128xf32, #tpu.memory_space<vmem>>, vector<2x128xf32>
    tpu.vector_store %arg16[%c0_52, %c0_53], %107 {strides = array<i32>} : memref<2x128xf32, #tpu.memory_space<vmem>>, vector<2x128xf32>,
    %109 = arith.addi %7, %37 : i32
    %110 = arith.addi %109, %64 : i32
    %111 = arith.addi %110, %84 : i32
    %112 = arith.addi %111, %99 : i32
    %c0_54 = arith.constant 0 : index
    %c0_55 = arith.constant 0 : index
    %113 = memref.load %arg17[%c0_54, %c0_55] : memref<1x1xi32, #tpu.memory_space<smem>>
    memref.store %112, %arg17[%c0_54, %c0_55] : memref<1x1xi32, #tpu.memory_space<smem>>
    return
  }
  func.func @transform_0(%arg0: i32) -> (i32, i32) {
    %c0_i32 = arith.constant 0 : i32
    %c0_i32_0 = arith.constant 0 : i32
    return %arg0, %c0_i32 : i32, i32
  }
  func.func @transform_1(%arg0: i32) -> (i32, i32) {
    %c0_i32 = arith.constant 0 : i32
    %c0_i32_0 = arith.constant 0 : i32
    %c0_i32_1 = arith.constant 0 : i32
    return %c0_i32, %c0_i32_0 : i32, i32
  }
  func.func @transform_2(%arg0: i32) -> (i32, i32) {
    %c0_i32 = arith.constant 0 : i32
    %c0_i32_0 = arith.constant 0 : i32
    %c0_i32_1 = arith.constant 0 : i32
    return %c0_i32, %c0_i32_0 : i32, i32
  }
  func.func @transform_3(%arg0: i32) -> (i32, i32) {
    %c0_i32 = arith.constant 0 : i32
    %c0_i32_0 = arith.constant 0 : i32
    %c0_i32_1 = arith.constant 0 : i32
    return %c0_i32, %c0_i32_0 : i32, i32
  }
  func.func @transform_4(%arg0: i32) -> (i32, i32) {
    %c0_i32 = arith.constant 0 : i32
    %c0_i32_0 = arith.constant 0 : i32
    %c0_i32_1 = arith.constant 0 : i32
    return %c0_i32, %c0_i32_0 : i32, i32
  }
  func.func @transform_5(%arg0: i32) -> (i32, i32) {
    %c0_i32 = arith.constant 0 : i32
    %c0_i32_0 = arith.constant 0 : i32
    %c0_i32_1 = arith.constant 0 : i32
    return %c0_i32, %c0_i32_0 : i32, i32
  }
  func.func @transform_6(%arg0: i32) -> (i32, i32) {
    %c0_i32 = arith.constant 0 : i32
    %c0_i32_0 = arith.constant 0 : i32
    %c0_i32_1 = arith.constant 0 : i32
    return %c0_i32, %c0_i32_0 : i32, i32
  }
  func.func @transform_7(%arg0: i32) -> (i32, i32) {
    %c0_i32 = arith.constant 0 : i32
    %c0_i32_0 = arith.constant 0 : i32
    %c0_i32_1 = arith.constant 0 : i32
    return %c0_i32, %c0_i32_0 : i32, i32
  }
  func.func @transform_8(%arg0: i32) -> (i32, i32) {
    %c0_i32 = arith.constant 0 : i32
    %c0_i32_0 = arith.constant 0 : i32
    %c0_i32_1 = arith.constant 0 : i32
    return %c0_i32, %c0_i32_0 : i32, i32
  }
  func.func @transform_9(%arg0: i32) -> (i32, i32) {
    %c0_i32 = arith.constant 0 : i32
    %c0_i32_0 = arith.constant 0 : i32
    %c0_i32_1 = arith.constant 0 : i32
    return %c0_i32, %c0_i32_0 : i32, i32
  }
  func.func @transform_10(%arg0: i32) -> (i32, i32) {
    %c0_i32 = arith.constant 0 : i32
    %c0_i32_0 = arith.constant 0 : i32
    %c0_i32_1 = arith.constant 0 : i32
    return %c0_i32, %c0_i32_0 : i32, i32
  }
  func.func @transform_11(%arg0: i32) -> (i32, i32) {
    %c0_i32 = arith.constant 0 : i32
    %c0_i32_0 = arith.constant 0 : i32
    %c0_i32_1 = arith.constant 0 : i32
    return %c0_i32, %c0_i32_0 : i32, i32
  }
  func.func @transform_12(%arg0: i32) -> (i32, i32) {
    %c0_i32 = arith.constant 0 : i32
    %c0_i32_0 = arith.constant 0 : i32
    %c0_i32_1 = arith.constant 0 : i32
    return %c0_i32, %c0_i32_0 : i32, i32
  }
  func.func @transform_13(%arg0: i32) -> (i32, i32) {
    %c0_i32 = arith.constant 0 : i32
    %c0_i32_0 = arith.constant 0 : i32
    %c0_i32_1 = arith.constant 0 : i32
    return %c0_i32, %c0_i32_0 : i32, i32
  }
  func.func @transform_14(%arg0: i32) -> (i32, i32) {
    %c0_i32 = arith.constant 0 : i32
    %c0_i32_0 = arith.constant 0 : i32
    %c0_i32_1 = arith.constant 0 : i32
    return %c0_i32, %c0_i32_0 : i32, i32
  }
  func.func @transform_15(%arg0: i32) -> (i32, i32) {
    %c0_i32 = arith.constant 0 : i32
    %c0_i32_0 = arith.constant 0 : i32
    return %arg0, %c0_i32 : i32, i32
  }
  func.func @transform_16(%arg0: i32) -> (i32, i32) {
    %c0_i32 = arith.constant 0 : i32
    %c0_i32_0 = arith.constant 0 : i32
    return %arg0, %c0_i32 : i32, i32
  }
}

</mosaic_0001>

<bundles_post_ra>
// kernel: lenet5_forward.1
= control target key start
LH: loop header
LB: loop body
LE: loop exit
PB: predicated region body
PF: predicated region fallthrough
CT: control target
= control target key end

     0   :  { %s4649_s0 = inlined_call_operand.vmem [shape: f32[14,112], index: 0, kind: input, shape index: {}]   ;;  %s4650_s1 = inlined_call_operand.vmem [shape: bf16[224,576], index: 1, kind: input, shape index: {}]   ;;  %s4651_s2 = inlined_call_operand.vmem [shape: f32[1,576], index: 2, kind: input, shape index: {}]   ;;  %s4652_s3 = inlined_call_operand.vmem [shape: f32[288,144], index: 3, kind: input, shape index: {}]   ;;  %s4653_s4 = inlined_call_operand.vmem [shape: f32[288,144], index: 4, kind: input, shape index: {}]   ;;  %s4654_s5 = inlined_call_operand.vmem [shape: bf16[432,256], index: 5, kind: input, shape index: {}]   ;;  %s4655_s6 = inlined_call_operand.vmem [shape: f32[1,256], index: 6, kind: input, shape index: {}]   ;;  %s4656_s7 = inlined_call_operand.vmem [shape: f32[128,64], index: 7, kind: input, shape index: {}]   ;;  %s4657_s8 = inlined_call_operand.vmem [shape: f32[128,64], index: 8, kind: input, shape index: {}]   ;;  %s4658_s9 = inlined_call_operand.vmem [shape: bf16[256,128], index: 9, kind: input, shape index: {}]   ;;  %s4659_s10 = inlined_call_operand.vmem [shape: f32[1,128], index: 10, kind: input, shape index: {}]   ;;  %s4660_s11 = inlined_call_operand.vmem [shape: bf16[128,128], index: 11, kind: input, shape index: {}]   ;;  %s4661_s12 = inlined_call_operand.vmem [shape: f32[1,128], index: 12, kind: input, shape index: {}]   ;;  %s4662_s13 = inlined_call_operand.vmem [shape: bf16[128,128], index: 13, kind: input, shape index: {}]   ;;  %s4663_s14 = inlined_call_operand.vmem [shape: f32[1,128], index: 14, kind: input, shape index: {}]   ;;  %s4664_s15 = inlined_call_operand.hbm [shape: f32[2,128], index: 15, kind: output, shape index: {0}]   ;;  %s4665_s16 = inlined_call_operand.hbm [shape: s32[1,1], index: 16, kind: output, shape index: {1}]  }
   0x1   :  { %4667 = sst [smem:[#allocation8_spill]] %s4649_s0 }
   0x2   :  { %22 = vsyncpa [#allocation3], 0  ;;  %s4668_s23 = sld [smem:[#allocation8_spill]]  ;;  %vm87_vm0 = vcmask 1045504   ;;  %v3036_v4 = vld [vmem:[%s4650_s1 + $0x4] ss:$20 sps:$4 sm:$0xff]  }
   0x3   :  { %v3038_v5 = vld [vmem:[%s4650_s1] ss:$20 sps:$4 sm:$0xff]   ;;  %580 = vmatprep.subr.bf16.mxu0 %v3036_v4  ;;  %v3041_v8 = vld [vmem:[%s4650_s1 + $0x8] ss:$20 sps:$4 sm:$0xff]   ;;  %v3047_v13 = vld [vmem:[%s4650_s1 + $0x30] ss:$20 sps:$4 sm:$0xff]  }
   0x4   :  { %v3039_v6 = vld [vmem:[%s4650_s1 + $0xc] ss:$20 sps:$4 sm:$0xff]   ;;  %581 = vmatpush1.bf16.msra.mxu0 %v3038_v5  ;;  %v3044_v11 = vld [vmem:[%s4650_s1 + $0x28] ss:$20 sps:$4 sm:$0xff]   ;;  %s3285_s28 = smov 112   ;;  %v3286_v62 = vmov 0  }
   0x5   :  { %623 = vmatprep.subr.bf16.mxu1 %v3039_v6  ;;  %v3042_v10 = vld [vmem:[%s4650_s1 + $0x2c] ss:$20 sps:$4 sm:$0xff]   ;;  %v3045_v12 = vld [vmem:[%s4650_s1 + $0x34] ss:$20 sps:$4 sm:$0xff]   ;;  %v3050_v15 = vld [vmem:[%s4650_s1 + $0x50] ss:$20 sps:$4 sm:$0xff]  }
   0x6   :  { %624 = vmatpush1.bf16.msra.mxu1 %v3041_v8  ;;  %582 = vmatprep.subr.bf16.mxu0 %v3042_v10  ;;  %v3048_v14 = vld [vmem:[%s4650_s1 + $0x54] ss:$20 sps:$4 sm:$0xff]   ;;  %v3051_v16 = vld [vmem:[%s4650_s1 + $0x5c] ss:$20 sps:$4 sm:$0xff]   ;;  %v3053_v17 = vld [vmem:[%s4650_s1 + $0x58] ss:$20 sps:$4 sm:$0xff]  }
   0x7   :  { %625 = vmatprep.subr.bf16.mxu1 %v3045_v12  ;;  %v3054_v18 = vld [vmem:[%s4650_s1 + $0x7c] ss:$20 sps:$4 sm:$0xff]   ;;  %v3057_v19 = vld [vmem:[%s4650_s1 + $0x84] ss:$20 sps:$4 sm:$0xff]   ;;  %v3059_v21 = vld [vmem:[%s4650_s1 + $0x80] ss:$20 sps:$4 sm:$0xff]  }
   0x8   :  { %v3383_v0 = vld [vmem:[%s4668_s23] sm:$0xff]  ;;  %v3388_v1 = vld [vmem:[%s4668_s23 + $0x8] sm:$0x3f]  ;;  %583 = vmatpush1.bf16.msra.mxu0 %v3044_v11  ;;  %v3075_v31 = vld [vmem:[%s4650_s1 + $0xfc] ss:$20 sps:$4 sm:$0xff]  }
   0x9   :  { %v88_v2 = vrot.slane %v3383_v0, 2  ;;  %v89_v3 = vrot.slane %v3388_v1, 2  ;;  %584 = vmatprep.subr.bf16.mxu0 %v3048_v14  ;;  %v3056_v20 = vld [vmem:[%s4650_s1 + $0x78] ss:$20 sps:$4 sm:$0xff]   ;;  %v3062_v24 = vld [vmem:[%s4650_s1 + $0xa0] ss:$20 sps:$4 sm:$0xff]  }
   0xa   :  { %626 = vmatpush1.bf16.msra.mxu1 %v3047_v13  ;;  %v3060_v22 = vld [vmem:[%s4650_s1 + $0xa4] ss:$20 sps:$4 sm:$0xff]   ;;  %v3063_v23 = vld [vmem:[%s4650_s1 + $0xac] ss:$20 sps:$4 sm:$0xff]   ;;  %v3065_v25 = vld [vmem:[%s4650_s1 + $0xa8] ss:$20 sps:$4 sm:$0xff]  }
   0xb   :  { %v90_v7 = vsel %vm87_vm0, %v88_v2, %v89_v3  ;;  %627 = vmatprep.subr.bf16.mxu1 %v3051_v16  ;;  %v3066_v26 = vld [vmem:[%s4650_s1 + $0xcc] ss:$20 sps:$4 sm:$0xff]   ;;  %v3069_v27 = vld [vmem:[%s4650_s1 + $0xd4] ss:$20 sps:$4 sm:$0xff]   ;;  %v3071_v29 = vld [vmem:[%s4650_s1 + $0xd0] ss:$20 sps:$4 sm:$0xff]  }
   0xc   :  { %v3006_v9 = vpack.i.bf16 %v89_v3, %v90_v7  ;;  %585 = vmatpush1.bf16.msra.mxu0 %v3050_v15  ;;  %v3068_v28 = vld [vmem:[%s4650_s1 + $0xc8] ss:$20 sps:$4 sm:$0xff]   ;;  %v3074_v32 = vld [vmem:[%s4650_s1 + $0xf0] ss:$20 sps:$4 sm:$0xff]   ;;  %v3077_v33 = vld [vmem:[%s4650_s1 + $0xf8] ss:$20 sps:$4 sm:$0xff]  }
   0xd   :  { %586 = vmatprep.subr.bf16.mxu0 %v3054_v18  ;;  %v3072_v30 = vld [vmem:[%s4650_s1 + $0xf4] ss:$20 sps:$4 sm:$0xff]   ;;  %v3078_v34 = vld [vmem:[%s4650_s1 + $0x11c] ss:$20 sps:$4 sm:$0xff]   ;;  %v3081_v35 = vld [vmem:[%s4650_s1 + $0x124] ss:$20 sps:$4 sm:$0xff]  }
   0xe   :  { %3007 = vrot.lane.b32.xlu0 %v3006_v9, %s3285_s28  ;;  %628 = vmatpush1.bf16.msra.mxu1 %v3053_v17  ;;  %v3080_v36 = vld [vmem:[%s4650_s1 + $0x118] ss:$20 sps:$4 sm:$0xff]   ;;  %v3083_v37 = vld [vmem:[%s4650_s1 + $0x120] ss:$20 sps:$4 sm:$0xff]   ;;  %v3089_v41 = vld [vmem:[%s4650_s1 + $0x148] ss:$20 sps:$4 sm:$0xff]  }
   0xf   :  { %629 = vmatprep.subr.bf16.mxu1 %v3057_v19  ;;  %v3084_v38 = vld [vmem:[%s4650_s1 + $0x144] ss:$20 sps:$4 sm:$0xff]   ;;  %v3087_v39 = vld [vmem:[%s4650_s1 + $0x14c] ss:$20 sps:$4 sm:$0xff]   ;;  %v3093_v43 = vld [vmem:[%s4650_s1 + $0x174] ss:$20 sps:$4 sm:$0xff]  }
  0x10   :  { %587 = vmatpush1.bf16.msra.mxu0 %v3056_v20  ;;  %v3086_v40 = vld [vmem:[%s4650_s1 + $0x140] ss:$20 sps:$4 sm:$0xff]   ;;  %v3092_v44 = vld [vmem:[%s4650_s1 + $0x168] ss:$20 sps:$4 sm:$0xff]   ;;  %v3095_v45 = vld [vmem:[%s4650_s1 + $0x170] ss:$20 sps:$4 sm:$0xff]  }
  0x11   :  { %588 = vmatprep.subr.bf16.mxu0 %v3060_v22  ;;  %v3090_v42 = vld [vmem:[%s4650_s1 + $0x16c] ss:$20 sps:$4 sm:$0xff]   ;;  %v3096_v46 = vld [vmem:[%s4650_s1 + $0x194] ss:$20 sps:$4 sm:$0xff]   ;;  %v3099_v47 = vld [vmem:[%s4650_s1 + $0x19c] ss:$20 sps:$4 sm:$0xff]  }
  0x12   :  { %630 = vmatpush1.bf16.msra.mxu1 %v3059_v21  ;;  %v3098_v48 = vld [vmem:[%s4650_s1 + $0x190] ss:$20 sps:$4 sm:$0xff]   ;;  %v3101_v49 = vld [vmem:[%s4650_s1 + $0x198] ss:$20 sps:$4 sm:$0xff]   ;;  %v3107_v53 = vld [vmem:[%s4650_s1 + $0x1c0] ss:$20 sps:$4 sm:$0xff]  }
  0x13   :  { %631 = vmatprep.subr.bf16.mxu1 %v3063_v23  ;;  %v3102_v50 = vld [vmem:[%s4650_s1 + $0x1bc] ss:$20 sps:$4 sm:$0xff]   ;;  %v3105_v51 = vld [vmem:[%s4650_s1 + $0x1c4] ss:$20 sps:$4 sm:$0xff]   ;;  %v3111_v55 = vld [vmem:[%s4650_s1 + $0x1ec] ss:$20 sps:$4 sm:$0xff]  }
  0x14   :  { %589 = vmatpush1.bf16.msra.mxu0 %v3062_v24  ;;  %v3104_v52 = vld [vmem:[%s4650_s1 + $0x1b8] ss:$20 sps:$4 sm:$0xff]   ;;  %v3110_v56 = vld [vmem:[%s4650_s1 + $0x1e0] ss:$20 sps:$4 sm:$0xff]   ;;  %v3113_v57 = vld [vmem:[%s4650_s1 + $0x1e8] ss:$20 sps:$4 sm:$0xff]  }
  0x15   :  { %590 = vmatprep.subr.bf16.mxu0 %v3066_v26  ;;  %v3108_v54 = vld [vmem:[%s4650_s1 + $0x1e4] ss:$20 sps:$4 sm:$0xff]   ;;  %v3114_v58 = vld [vmem:[%s4650_s1 + $0x20c] ss:$20 sps:$4 sm:$0xff]   ;;  %v3116_v59 = vld [vmem:[%s4650_s1 + $0x208] ss:$20 sps:$4 sm:$0xff]  }
  0x16   :  { %632 = vmatpush1.bf16.msra.mxu1 %v3065_v25  ;;  %v3117_v60 = vld [vmem:[%s4650_s1 + $0x214] ss:$20 sps:$4 sm:$0xff]   ;;  %v3119_v61 = vld [vmem:[%s4650_s1 + $0x210] ss:$20 sps:$4 sm:$0xff]  }
  0x17   :  { %633 = vmatprep.subr.bf16.mxu1 %v3069_v27 }
  0x18   :  { %591 = vmatpush1.bf16.msra.mxu0 %v3068_v28 }
  0x19   :  { %592 = vmatprep.subr.bf16.mxu0 %v3072_v30 }
  0x1a   :  { %634 = vmatpush1.bf16.msra.mxu1 %v3071_v29 }
  0x1b   :  { %635 = vmatprep.subr.bf16.mxu1 %v3075_v31 }
  0x1c   :  { %593 = vmatpush1.bf16.msra.mxu0 %v3074_v32 }
  0x1d   :  { %594 = vmatprep.subr.bf16.mxu0 %v3078_v34 }
  0x1e   :  { %636 = vmatpush1.bf16.msra.mxu1 %v3077_v33 }
  0x1f   :  { %637 = vmatprep.subr.bf16.mxu1 %v3081_v35 }
  0x20   :  { %595 = vmatpush1.bf16.msra.mxu0 %v3080_v36 }
  0x21   :  { %596 = vmatprep.subr.bf16.mxu0 %v3084_v38 }
  0x22   :  { %638 = vmatpush1.bf16.msra.mxu1 %v3083_v37 }
  0x23   :  { %639 = vmatprep.subr.bf16.mxu1 %v3087_v39 }
  0x24   :  { %597 = vmatpush1.bf16.msra.mxu0 %v3086_v40 }
  0x25   :  { %598 = vmatprep.subr.bf16.mxu0 %v3090_v42 }
  0x26   :  { %640 = vmatpush1.bf16.msra.mxu1 %v3089_v41 }
  0x27   :  { %641 = vmatprep.subr.bf16.mxu1 %v3093_v43 }
  0x28   :  { %599 = vmatpush1.bf16.msra.mxu0 %v3092_v44 }
  0x29   :  { %600 = vmatprep.subr.bf16.mxu0 %v3096_v46 }
  0x2a   :  { %642 = vmatpush1.bf16.msra.mxu1 %v3095_v45 }
  0x2b   :  { %643 = vmatprep.subr.bf16.mxu1 %v3099_v47 }
  0x2c   :  { %601 = vmatpush1.bf16.msra.mxu0 %v3098_v48 }
  0x2d   :  { %602 = vmatprep.subr.bf16.mxu0 %v3102_v50 }
  0x2e   :  { %644 = vmatpush1.bf16.msra.mxu1 %v3101_v49 }
  0x2f   :  { %645 = vmatprep.subr.bf16.mxu1 %v3105_v51 }
  0x30   :  { %603 = vmatpush1.bf16.msra.mxu0 %v3104_v52 }
  0x31   :  { %604 = vmatprep.subr.bf16.mxu0 %v3108_v54 }
  0x32   :  { %646 = vmatpush1.bf16.msra.mxu1 %v3107_v53 }
  0x33   :  { %647 = vmatprep.subr.bf16.mxu1 %v3111_v55 }
  0x34   :  { %605 = vmatpush1.bf16.msra.mxu0 %v3110_v56 }
  0x35   :  { %606 = vmatprep.subr.bf16.mxu0 %v3114_v58 }
  0x36   :  { %648 = vmatpush1.bf16.msra.mxu1 %v3113_v57 }
  0x37   :  { %649 = vmatprep.subr.bf16.mxu1 %v3117_v60 }
  0x38   :  { %607 = vmatpush1.bf16.msra.mxu0 %v3116_v59 }
  0x39   :  { %666 = vmatprep.subr.bf16.mxu0 %v3286_v62 }
  0x3a   :  { %650 = vmatpush1.bf16.msra.mxu1 %v3119_v61 }
  0x3b   :  { %23 = vsyncpa [#allocation4], 0  ;;  %vm61_vm1 = vcmask 916480   ;;  %vm576_vm2 = vcmask 785408   ;;  %v3120_v7 = vld [vmem:[%s4650_s1 + $0x10] ss:$20 sps:$4 sm:$0xff]   ;;  %v187_v20 = vlaneseq }
  0x3c   :  { %v3121_v9 = vld [vmem:[%s4650_s1 + $0x38] ss:$20 sps:$4 sm:$0xff]   ;;  %v3124_v10 = vld [vmem:[%s4650_s1 + $0xb0] ss:$20 sps:$4 sm:$0xff]   ;;  %v3126_v12 = vld [vmem:[%s4650_s1 + $0x100] ss:$20 sps:$4 sm:$0xff]  }
  0x3d   :  { %v3125_v11 = vld [vmem:[%s4650_s1 + $0xd8] ss:$20 sps:$4 sm:$0xff]   ;;  %v3127_v13 = vld [vmem:[%s4650_s1 + $0x128] ss:$20 sps:$4 sm:$0xff]   ;;  %v3128_v14 = vld [vmem:[%s4650_s1 + $0x150] ss:$20 sps:$4 sm:$0xff]  }
  0x3e   :  { %v3129_v15 = vld [vmem:[%s4650_s1 + $0x178] ss:$20 sps:$4 sm:$0xff]   ;;  %v3130_v16 = vld [vmem:[%s4650_s1 + $0x1a0] ss:$20 sps:$4 sm:$0xff]   ;;  %v3131_v17 = vld [vmem:[%s4650_s1 + $0x1c8] ss:$20 sps:$4 sm:$0xff]  }
  0x3f   :  { %v3132_v18 = vld [vmem:[%s4650_s1 + $0x1f0] ss:$20 sps:$4 sm:$0xff]   ;;  %v3133_v19 = vld [vmem:[%s4650_s1 + $0x218] ss:$20 sps:$4 sm:$0xff]   ;;  %v3622_v21 = vshrl.u32 %v187_v20, 7  ;;  %v3287_v51 = vmov 0.0  }
  0x40   :  { %v3628_v23 = vld [vmem:[%s4651_s2] sm:$0x1f]  ;;  %v781_v44 = vld [vmem:[%s4652_s3 + $0x8] sm:$0xff]  ;;  %v783_v45 = vld [vmem:[%s4652_s3 + $0x18] sm:$0xff]  ;;  %vm852_vm3 = vcmask 261120   ;;  %vm777_vm4 = vcmask 130048  }
  0x41   :  { %v201_v22 = vsub.s32 3, %v3622_v21  ;;  %v205_v35 = vsub.s32 4, %v3622_v21  ;;  %v780_v46 = vld [vmem:[%s4652_s3] sm:$0xff]  ;;  %v2780_v47 = vpack.c.bf16 %v783_v45, %v781_v44  ;;  %v782_v48 = vld [vmem:[%s4652_s3 + $0x10] sm:$0xff]  ;;  %v785_v49 = vld [vmem:[%s4652_s3 + $0x28] sm:$0xff]  ;;  %vm1250_vm6 = vcmask 1043456  }
  0x42   :  { %v787_v50 = vld [vmem:[%s4652_s3 + $0x38] sm:$0xff]  ;;  %v2782_v54 = vpack.c.bf16 %v782_v48, %v780_v46  ;;  %v784_v56 = vld [vmem:[%s4652_s3 + $0x20] sm:$0xff]  ;;  %v786_v57 = vld [vmem:[%s4652_s3 + $0x30] sm:$0xff]  ;;  %vm1252_vm7 = vcmask 125952   ;;  %s3288_s19 = smov 16   ;;  %s3289_s20 = smov 32  }
  0x43   :  { %v202_v24 = vrot.slane %v3628_v23, %v201_v22  ;;  %v206_v36 = vrot.slane %v3628_v23, %v205_v35  ;;  %v2784_v55 = vpack.c.bf16 %v787_v50, %v785_v49  ;;  %v789_v58 = vld [vmem:[%s4652_s3 + $0x48] sm:$0xff]  ;;  %2781 = vmatprep.subr.bf16.mxu1 %v2780_v47  ;;  %v791_v59 = vld [vmem:[%s4652_s3 + $0x58] sm:$0xff]  ;;  %v2786_v60 = vpack.c.bf16 %v786_v57, %v784_v56  ;;  %v800_v22 = vld [vmem:[%s4652_s3 + $0xa0] sm:$0xff] }
  0x44   :  { %v2788_v61 = vpack.c.bf16 %v791_v59, %v789_v58  ;;  %v1012_v45 = vld [vmem:[%s4653_s4 + $0x8] sm:$0xff]  ;;  %v1014_v46 = vld [vmem:[%s4653_s4 + $0x18] sm:$0xff]  ;;  %v804_v48 = vld [vmem:[%s4652_s3 + $0xc0] sm:$0xff]  ;;  %vm1648_vm11 = vcmask 392192   ;;  %vm3291_vm12 = vmmov 0   ;;  %vm63_vm15 = vcmask 914432  }
  0x45   :  { %v806_v49 = vld [vmem:[%s4652_s3 + $0xd0] sm:$0xff]  ;;  %v2852_v50 = vpack.c.bf16 %v1014_v46, %v1012_v45  ;;  %v808_v57 = vld [vmem:[%s4652_s3 + $0xe0] sm:$0xff]  ;;  %v813_v59 = vld [vmem:[%s4652_s3 + $0x108] sm:$0xff] }
  0x46   :  { %v810_v58 = vld [vmem:[%s4652_s3 + $0xf0] sm:$0xff] }
  0x80   :  { %v3008_v63 = vpop.permute.xlu0 %3007 }
  0x81   :  { %v3010_v2 = vunpack.i.h.bf16 %v3008_v63  ;;  %v3009_v3 = vunpack.i.l.bf16 %v3008_v63  ;;  %v788_v63 = vld [vmem:[%s4652_s3 + $0x40] sm:$0xff] }
  0x83   :  { %v100_v4 = vpack.c.bf16 %v3010_v2, %v3009_v3  ;;  %v97_v5 = vsel %vm61_vm1, %v3383_v0, %v3009_v3  ;;  %v98_v6 = vsel %vm61_vm1, %v3388_v1, %v3010_v2  ;;  %v3122_v0 = vld [vmem:[%s4650_s1 + $0x60] ss:$20 sps:$4 sm:$0xff]   ;;  %v3123_v1 = vld [vmem:[%s4650_s1 + $0x88] ss:$20 sps:$4 sm:$0xff]   ;;  %s3292_s1 = smov 64  }
  0x84   :  { %v99_v8 = vpack.c.bf16 %v98_v6, %v97_v5  ;;  %v790_v2 = vld [vmem:[%s4652_s3 + $0x50] sm:$0xff]  ;;  %v795_v5 = vld [vmem:[%s4652_s3 + $0x78] sm:$0xff] }
  0x85   :  { %2499 = vmatprep.mubr.msk.bf16.mxu0 %vm576_vm2, %v100_v4  ;;  %2500 = vmatprep.mubr.msk.bf16.mxu1 %vm576_vm2, %v100_v4  ;;  %v2790_v6 = vpack.c.bf16 %v790_v2, %v788_v63  ;;  %v812_v2 = vld [vmem:[%s4652_s3 + $0x100] sm:$0xff] }
  0x86   :  { %613 = vmatmul.mubr.bf16.vlgmr.msra.gmra.mrb[0].mxu0 %v99_v8  ;;  %656 = vmatmul.mubr.bf16.vlgmr.msra.gmra.mrb[0].mxu1 %v99_v8 }
  0x87   :  { %667 = vmatpush1.bf16.msra.mxu0 %v3120_v7  ;;  %2501 = vmatprep.mubr.msk.bf16.mxu0 %vm576_vm2, %v100_v4  ;;  %v793_v4 = vld [vmem:[%s4652_s3 + $0x68] sm:$0xff]  ;;  %vm2126_vm2 = vcmask 1041408  }
  0x88   :  { %668 = vmatprep.subr.bf16.mxu0 %v3286_v62  ;;  %2783 = vmatpush1.bf16.msra.mxu1 %v2782_v54  ;;  %v2792_v7 = vpack.c.bf16 %v795_v5, %v793_v4  ;;  %v811_v54 = vld [vmem:[%s4652_s3 + $0xf8] sm:$0xff]  ;;  %v814_v4 = vld [vmem:[%s4652_s3 + $0x110] sm:$0xff]  ;;  %v817_v5 = vld [vmem:[%s4652_s3 + $0x128] sm:$0xff] }
  0x89   :  { %2785 = vmatprep.subr.bf16.mxu1 %v2784_v55  ;;  %v2806_v55 = vpack.c.bf16 %v806_v49, %v804_v48  ;;  %v837_v48 = vld [vmem:[%s4652_s3 + $0x1c8] sm:$0xff]  ;;  %v839_v49 = vld [vmem:[%s4652_s3 + $0x1d8] sm:$0xff] }
  0x8b   :  { %669 = vmatpush1.bf16.msra.mxu0 %v3121_v9  ;;  %v794_v9 = vld [vmem:[%s4652_s3 + $0x70] sm:$0xff] }
  0x8c   :  { %670 = vmatprep.subr.bf16.mxu0 %v3286_v62  ;;  %2787 = vmatpush1.bf16.msra.mxu1 %v2786_v60  ;;  %v815_v60 = vld [vmem:[%s4652_s3 + $0x118] sm:$0xff] }
  0x8d   :  { %2789 = vmatprep.subr.bf16.mxu1 %v2788_v61  ;;  %v2810_v61 = vpack.c.bf16 %v810_v58, %v808_v57  ;;  %v2812_v63 = vpack.c.bf16 %v815_v60, %v813_v59  ;;  %v841_v58 = vld [vmem:[%s4652_s3 + $0x1e8] sm:$0xff]  ;;  %v843_v59 = vld [vmem:[%s4652_s3 + $0x1f8] sm:$0xff] }
  0x8f   :  { %671 = vmatpush1.bf16.msra.mxu0 %v3122_v0  ;;  %v797_v0 = vld [vmem:[%s4652_s3 + $0x88] sm:$0xff] }
  0x90   :  { %672 = vmatprep.subr.bf16.mxu0 %v3286_v62  ;;  %2791 = vmatpush1.bf16.msra.mxu1 %v2790_v6  ;;  %v819_v6 = vld [vmem:[%s4652_s3 + $0x138] sm:$0xff] }
  0x91   :  { %2793 = vmatprep.subr.bf16.mxu1 %v2792_v7  ;;  %v2814_v7 = vpack.c.bf16 %v814_v4, %v812_v2 }
  0x93   :  { %673 = vmatpush1.bf16.msra.mxu0 %v3123_v1  ;;  %v799_v1 = vld [vmem:[%s4652_s3 + $0x98] sm:$0xff] }
  0x94   :  { %674 = vmatprep.subr.bf16.mxu0 %v3286_v62 }
  0x97   :  { %675 = vmatpush1.bf16.msra.mxu0 %v3124_v10 }
  0x98   :  { %676 = vmatprep.subr.bf16.mxu0 %v3286_v62 }
  0x9b   :  { %677 = vmatpush1.bf16.msra.mxu0 %v3125_v11  ;;  %v2796_v11 = vpack.c.bf16 %v799_v1, %v797_v0  ;;  %v818_v0 = vld [vmem:[%s4652_s3 + $0x130] sm:$0xff]  ;;  %v821_v1 = vld [vmem:[%s4652_s3 + $0x148] sm:$0xff] }
  0x9c   :  { %678 = vmatprep.subr.bf16.mxu0 %v3286_v62 }
  0x9f   :  { %679 = vmatpush1.bf16.msra.mxu0 %v3126_v12  ;;  %v796_v12 = vld [vmem:[%s4652_s3 + $0x80] sm:$0xff] }
  0xa0   :  { %680 = vmatprep.subr.bf16.mxu0 %v3286_v62 }
  0xa3   :  { %681 = vmatpush1.bf16.msra.mxu0 %v3127_v13  ;;  %v798_v13 = vld [vmem:[%s4652_s3 + $0x90] sm:$0xff] }
  0xa4   :  { %682 = vmatprep.subr.bf16.mxu0 %v3286_v62  ;;  %v2798_v20 = vpack.c.bf16 %v798_v13, %v796_v12  ;;  %v820_v13 = vld [vmem:[%s4652_s3 + $0x140] sm:$0xff] }
  0xa7   :  { %683 = vmatpush1.bf16.msra.mxu0 %v3128_v14  ;;  %v801_v14 = vld [vmem:[%s4652_s3 + $0xa8] sm:$0xff] }
  0xa8   :  { %684 = vmatprep.subr.bf16.mxu0 %v3286_v62 }
  0xab   :  { %685 = vmatpush1.bf16.msra.mxu0 %v3129_v15  ;;  %v803_v15 = vld [vmem:[%s4652_s3 + $0xb8] sm:$0xff] }
  0xac   :  { %686 = vmatprep.subr.bf16.mxu0 %v3286_v62  ;;  %v2800_v35 = vpack.c.bf16 %v803_v15, %v801_v14  ;;  %v822_v14 = vld [vmem:[%s4652_s3 + $0x150] sm:$0xff]  ;;  %v825_v15 = vld [vmem:[%s4652_s3 + $0x168] sm:$0xff] }
  0xaf   :  { %687 = vmatpush1.bf16.msra.mxu0 %v3130_v16  ;;  %v845_v16 = vld [vmem:[%s4652_s3 + $0x208] sm:$0xff] }
  0xb0   :  { %688 = vmatprep.subr.bf16.mxu0 %v3286_v62 }
  0xb3   :  { %689 = vmatpush1.bf16.msra.mxu0 %v3131_v17  ;;  %v847_v17 = vld [vmem:[%s4652_s3 + $0x218] sm:$0xff] }
  0xb4   :  { %690 = vmatprep.subr.bf16.mxu0 %v3286_v62 }
  0xb7   :  { %691 = vmatpush1.bf16.msra.mxu0 %v3132_v18  ;;  %v844_v18 = vld [vmem:[%s4652_s3 + $0x200] sm:$0xff] }
  0xb8   :  { %692 = vmatprep.subr.bf16.mxu0 %v3286_v62 }
  0xbb   :  { %693 = vmatpush1.bf16.msra.mxu0 %v3133_v19  ;;  %v846_v19 = vld [vmem:[%s4652_s3 + $0x210] sm:$0xff] }
  0xbe   :  { %699 = vmatmul.mubr.bf16.vlgmr.msra.gmra.mrb[4].mxu0 %v99_v8  ;;  %v792_v8 = vld [vmem:[%s4652_s3 + $0x60] sm:$0xff] }
  0xbf   :  { %998 = vmatprep.mubr.f32.mxu0 %v3287_v51  ;;  %v2794_v10 = vpack.c.bf16 %v794_v9, %v792_v8  ;;  %v2816_v8 = vpack.c.bf16 %v819_v6, %v817_v5  ;;  %v816_v9 = vld [vmem:[%s4652_s3 + $0x120] sm:$0xff] }
  0xc1   :  { %2795 = vmatpush1.bf16.msra.mxu1 %v2794_v10  ;;  %v823_v10 = vld [vmem:[%s4652_s3 + $0x158] sm:$0xff] }
  0xc2   :  { %2797 = vmatprep.subr.bf16.mxu1 %v2796_v11  ;;  %v2818_v11 = vpack.c.bf16 %v818_v0, %v816_v9  ;;  %v2820_v12 = vpack.c.bf16 %v823_v10, %v821_v1 }
  0xc5   :  { %2799 = vmatpush1.bf16.msra.mxu1 %v2798_v20  ;;  %v826_v20 = vld [vmem:[%s4652_s3 + $0x170] sm:$0xff] }
  0xc6   :  { %2801 = vmatprep.subr.bf16.mxu1 %v2800_v35  ;;  %v828_v35 = vld [vmem:[%s4652_s3 + $0x180] sm:$0xff] }
 0x159   :  { %v3631_v25 = vpop.f32.mrb[0].mxu0  ;;  %v3633_v26 = vpop.f32.mrb[0].mxu1 }
 0x15a   :  { %v3635_v27 = vpop.f32.mrb[1].mxu0  ;;  %v659_v28 = vpop.f32.mrb[1].mxu1 }
 0x15b   :  { %v3637_v29 = vadd.f32 %v659_v28, %v202_v24  ;;  %v3639_v30 = vpop.f32.mrb[2].mxu0  ;;  %v3641_v31 = vpop.f32.mrb[2].mxu1  ;;  %v2844_v28 = vpack.c.bf16 %v847_v17, %v845_v16  ;;  %v827_v16 = vld [vmem:[%s4652_s3 + $0x178] sm:$0xff]  ;;  %v2822_v17 = vpack.c.bf16 %v822_v14, %v820_v13  ;;  %v1013_v14 = vld [vmem:[%s4653_s4 + $0x10] sm:$0xff] }
 0x15c   :  { %v3643_v32 = vpop.f32.mrb[3].mxu0  ;;  %v663_v33 = vpop.f32.mrb[3].mxu1 }
 0x15d   :  { %v710_v34 = vmax.f32 %v3637_v29, 0.0  ;;  %v3670_v52 = vadd.f32 %v663_v33, %v202_v24  ;;  %v802_v24 = vld [vmem:[%s4652_s3 + $0xb0] sm:$0xff]  ;;  %v2846_v33 = vpack.c.bf16 %v846_v19, %v844_v18  ;;  %2845 = vmatprep.subr.bf16.mxu0 %v2844_v28  ;;  %v2824_v18 = vpack.c.bf16 %v827_v16, %v825_v15  ;;  %v824_v19 = vld [vmem:[%s4652_s3 + $0x160] sm:$0xff]  ;;  %v1016_v16 = vld [vmem:[%s4653_s4 + $0x28] sm:$0xff] }
 0x15e   :  { %v2802_v44 = vpack.c.bf16 %v802_v24, %v800_v22  ;;  %v829_v22 = vld [vmem:[%s4652_s3 + $0x188] sm:$0xff]  ;;  %v831_v24 = vld [vmem:[%s4652_s3 + $0x198] sm:$0xff]  ;;  %v2826_v28 = vpack.c.bf16 %v826_v20, %v824_v19  ;;  %v189_v15 = vsub.s32 0, %v3622_v21  ;;  %v1015_v20 = vld [vmem:[%s4653_s4 + $0x20] sm:$0xff] }
 0x15f   :  { %743 = vrot.lane.b32.xlu1 %v710_v34, %s3285_s28  ;;  %v715_v3 = vmax.f32 %v3670_v52, 0.0  ;;  %2847 = vmatpush1.bf16.msra.mxu0 %v2846_v33  ;;  %v2828_v33 = vpack.c.bf16 %v831_v24, %v829_v22  ;;  %v1017_v22 = vld [vmem:[%s4653_s4 + $0x30] sm:$0xff] }
 0x160   :  { %2803 = vmatpush1.bf16.msra.mxu1 %v2802_v44  ;;  %v834_v44 = vld [vmem:[%s4652_s3 + $0x1b0] sm:$0xff]  ;;  %v190_v24 = vrot.slane %v3628_v23, %v189_v15 }
 0x191   :  { %v700_v37 = vpop.f32.mrb[4].mxu0 }
 0x192   :  { %v701_v38 = vadd.f32 %v700_v37, %v206_v36  ;;  %v702_v39 = vpop.f32.mrb[5].mxu0  ;;  %v849_v37 = vld [vmem:[%s4652_s3 + $0x228] sm:$0xff] }
 0x193   :  { %v703_v40 = vpop.f32.mrb[6].mxu0  ;;  %v807_v39 = vld [vmem:[%s4652_s3 + $0xd8] sm:$0xff] }
 0x194   :  { %v711_v41 = vmax.f32 %v701_v38, 0.0  ;;  %v704_v42 = vadd.f32 %v703_v40, %v206_v36  ;;  %v705_v43 = vpop.f32.mrb[7].mxu0  ;;  %v805_v36 = vld [vmem:[%s4652_s3 + $0xc8] sm:$0xff]  ;;  %v851_v38 = vld [vmem:[%s4652_s3 + $0x238] sm:$0xff] }
 0x195   :  { %v2848_v40 = vpack.c.bf16 %v851_v38, %v849_v37  ;;  %v2804_v47 = vpack.c.bf16 %v807_v39, %v805_v36  ;;  %v830_v36 = vld [vmem:[%s4652_s3 + $0x190] sm:$0xff]  ;;  %v197_v38 = vsub.s32 2, %v3622_v21  ;;  %v193_v39 = vsub.s32 1, %v3622_v21 }
 0x196   :  { %v716_v53 = vmax.f32 %v704_v42, 0.0  ;;  %745 = vrot.lane.b32.xlu0 %v711_v41, %s3285_s28  ;;  %v848_v41 = vld [vmem:[%s4652_s3 + $0x220] sm:$0xff]  ;;  %v850_v42 = vld [vmem:[%s4652_s3 + $0x230] sm:$0xff]  ;;  %v2830_v37 = vpack.c.bf16 %v830_v36, %v828_v35  ;;  %v1022_v35 = vld [vmem:[%s4653_s4 + $0x58] sm:$0xff]  ;;  %v2858_v36 = vpack.c.bf16 %v1017_v22, %v1015_v20 }
 0x197   :  { %v2850_v43 = vpack.c.bf16 %v850_v42, %v848_v41  ;;  %2849 = vmatprep.subr.bf16.mxu0 %v2848_v40  ;;  %2805 = vmatprep.subr.bf16.mxu1 %v2804_v47  ;;  %v833_v40 = vld [vmem:[%s4652_s3 + $0x1a8] sm:$0xff]  ;;  %v835_v41 = vld [vmem:[%s4652_s3 + $0x1b8] sm:$0xff]  ;;  %v198_v46 = vrot.slane %v3628_v23, %v197_v38  ;;  %v194_v47 = vrot.slane %v3628_v23, %v193_v39  ;;  %v1019_v23 = vld [vmem:[%s4653_s4 + $0x40] sm:$0xff] }
 0x198   :  { %749 = vrot.lane.b32.xlu1 %v716_v53, %s3285_s28  ;;  %v809_v53 = vld [vmem:[%s4652_s3 + $0xe8] sm:$0xff]  ;;  %2807 = vmatpush1.bf16.msra.mxu1 %v2806_v55  ;;  %v2832_v42 = vpack.c.bf16 %v835_v41, %v833_v40  ;;  %v1021_v38 = vld [vmem:[%s4653_s4 + $0x50] sm:$0xff]  ;;  %v615_v40 = vadd.f32 %v3631_v25, %v190_v24  ;;  %v1042_v20 = vld [vmem:[%s4653_s4 + $0xf8] sm:$0xff] }
 0x199   :  { %2851 = vmatpush1.bf16.msra.mxu0 %v2850_v43  ;;  %v2808_v56 = vpack.c.bf16 %v811_v54, %v809_v53  ;;  %v832_v43 = vld [vmem:[%s4652_s3 + $0x1a0] sm:$0xff]  ;;  %v838_v54 = vld [vmem:[%s4652_s3 + $0x1d0] sm:$0xff]  ;;  %v3878_v57 = vadd.f32 %v3635_v27, %v194_v47  ;;  %v662_v60 = vadd.f32 %v3641_v31, %v198_v46  ;;  %v3901_v10 = vadd.f32 %v3643_v32, %v194_v47 }
 0x19a   :  { %2853 = vmatprep.subr.bf16.mxu0 %v2852_v50  ;;  %v2834_v45 = vpack.c.bf16 %v834_v44, %v832_v43  ;;  %v2836_v50 = vpack.c.bf16 %v839_v49, %v837_v48  ;;  %v836_v53 = vld [vmem:[%s4652_s3 + $0x1c0] sm:$0xff]  ;;  %v842_v27 = vld [vmem:[%s4652_s3 + $0x1f0] sm:$0xff]  ;;  %v1024_v43 = vld [vmem:[%s4653_s4 + $0x68] sm:$0xff]  ;;  %v2862_v47 = vpack.c.bf16 %v1021_v38, %v1019_v23 }
 0x19b   :  { %2809 = vmatprep.subr.bf16.mxu1 %v2808_v56  ;;  %v2838_v55 = vpack.c.bf16 %v838_v54, %v836_v53  ;;  %v658_v56 = vadd.f32 %v3633_v26, %v198_v46  ;;  %v840_v26 = vld [vmem:[%s4652_s3 + $0x1e0] sm:$0xff]  ;;  %v708_v6 = vmax.f32 %v3878_v57, 0.0  ;;  %v713_v13 = vmax.f32 %v3901_v10, 0.0  ;;  %v1026_v44 = vld [vmem:[%s4653_s4 + $0x78] sm:$0xff]  ;;  %v1025_v49 = vld [vmem:[%s4653_s4 + $0x70] sm:$0xff] }
 0x19c   :  { %747 = vrot.lane.b32.xlu1 %v715_v3, %s3285_s28  ;;  %2811 = vmatpush1.bf16.msra.mxu1 %v2810_v61  ;;  %v2842_v2 = vpack.c.bf16 %v842_v27, %v840_v26  ;;  %v1011_v32 = vld [vmem:[%s4653_s4] sm:$0xff]  ;;  %v2864_v25 = vpack.c.bf16 %v1026_v44, %v1024_v43  ;;  %v619_v53 = vadd.f32 %v3639_v30, %v190_v24  ;;  %v1048_v43 = vld [vmem:[%s4653_s4 + $0x128] sm:$0xff]  ;;  %v1050_v44 = vld [vmem:[%s4653_s4 + $0x138] sm:$0xff] }
 0x19d   :  { %2813 = vmatprep.subr.bf16.mxu1 %v2812_v63  ;;  %v2840_v63 = vpack.c.bf16 %v843_v59, %v841_v58  ;;  %v709_v4 = vmax.f32 %v658_v56, 0.0  ;;  %v1023_v48 = vld [vmem:[%s4653_s4 + $0x60] sm:$0xff]  ;;  %v1030_v56 = vld [vmem:[%s4653_s4 + $0x98] sm:$0xff]  ;;  %v1825_v21 = vld [vmem:[%s4657_s8 + $0x10] sm:$0xff] }
 0x19e   :  { %v2866_v27 = vpack.c.bf16 %v1025_v49, %v1023_v48  ;;  %v1052_v48 = vld [vmem:[%s4653_s4 + $0x148] sm:$0xff]  ;;  %v1054_v49 = vld [vmem:[%s4653_s4 + $0x158] sm:$0xff] }
 0x1a0   :  { %2815 = vmatpush1.bf16.msra.mxu1 %v2814_v7 }
 0x1a1   :  { %2817 = vmatprep.subr.bf16.mxu1 %v2816_v8  ;;  %v714_v8 = vmax.f32 %v662_v60, 0.0 }
 0x1a4   :  { %2819 = vmatpush1.bf16.msra.mxu1 %v2818_v11 }
 0x1a5   :  { %2821 = vmatprep.subr.bf16.mxu1 %v2820_v12  ;;  %v3011_v12 = vpack.i.bf16 %v708_v6, %v709_v4 }
 0x1a8   :  { %2823 = vmatpush1.bf16.msra.mxu1 %v2822_v17  ;;  %v1018_v17 = vld [vmem:[%s4653_s4 + $0x38] sm:$0xff] }
 0x1a9   :  { %2825 = vmatprep.subr.bf16.mxu1 %v2824_v18  ;;  %v2854_v18 = vpack.c.bf16 %v1013_v14, %v1011_v32  ;;  %v2856_v19 = vpack.c.bf16 %v1018_v17, %v1016_v16  ;;  %v1038_v32 = vld [vmem:[%s4653_s4 + $0xd8] sm:$0xff]  ;;  %v1035_v17 = vld [vmem:[%s4653_s4 + $0xc0] sm:$0xff] }
 0x1ac   :  { %2827 = vmatpush1.bf16.msra.mxu1 %v2826_v28 }
 0x1ad   :  { %2829 = vmatprep.subr.bf16.mxu1 %v2828_v33  ;;  %v1020_v33 = vld [vmem:[%s4653_s4 + $0x48] sm:$0xff] }
 0x1b0   :  { %2831 = vmatpush1.bf16.msra.mxu1 %v2830_v37  ;;  %v2860_v37 = vpack.c.bf16 %v1022_v35, %v1020_v33  ;;  %v1039_v33 = vld [vmem:[%s4653_s4 + $0xe0] sm:$0xff]  ;;  %v1041_v35 = vld [vmem:[%s4653_s4 + $0xf0] sm:$0xff] }
 0x1b1   :  { %2833 = vmatprep.subr.bf16.mxu1 %v2832_v42  ;;  %v2882_v23 = vpack.c.bf16 %v1041_v35, %v1039_v33  ;;  %v1075_v33 = vld [vmem:[%s4653_s4 + $0x200] sm:$0xff]  ;;  %v1077_v35 = vld [vmem:[%s4653_s4 + $0x210] sm:$0xff] }
 0x1b4   :  { %2835 = vmatpush1.bf16.msra.mxu1 %v2834_v45 }
 0x1b5   :  { %2837 = vmatprep.subr.bf16.mxu1 %v2836_v50  ;;  %v707_v50 = vmax.f32 %v615_v40, 0.0  ;;  %v1043_v40 = vld [vmem:[%s4653_s4 + $0x100] sm:$0xff] }
 0x1b8   :  { %2839 = vmatpush1.bf16.msra.mxu1 %v2838_v55  ;;  %v1028_v55 = vld [vmem:[%s4653_s4 + $0x88] sm:$0xff] }
 0x1b9   :  { %2841 = vmatprep.subr.bf16.mxu1 %v2840_v63 }
 0x1bc   :  { %2843 = vmatpush1.bf16.msra.mxu1 %v2842_v2 }
 0x1d1   :  { %v744_v61 = vpop.permute.xlu1 %743 }
 0x208   :  { %v746_v5 = vpop.permute.xlu0 %745 }
 0x209   :  { %v751_v7 = vsel %vm61_vm1, %v744_v61, %v746_v5  ;;  %v758_v31 = vmax.f32 %v710_v34, %v746_v5  ;;  %v2868_v5 = vpack.c.bf16 %v1030_v56, %v1028_v55  ;;  %v1053_v55 = vld [vmem:[%s4653_s4 + $0x150] sm:$0xff]  ;;  %v1056_v56 = vld [vmem:[%s4653_s4 + $0x168] sm:$0xff] }
 0x20a   :  { %v757_v9 = vmax.f32 %v709_v4, %v751_v7  ;;  %v750_v0 = vpop.permute.xlu1 %749  ;;  %v1027_v7 = vld [vmem:[%s4653_s4 + $0x80] sm:$0xff] }
 0x20b   :  { %v760_v1 = vmax.f32 %v715_v3, %v750_v0  ;;  %767 = vrot.lane.b32.xlu0 %v758_v31, %s3285_s28  ;;  %v1029_v31 = vld [vmem:[%s4653_s4 + $0x90] sm:$0xff] }
 0x20c   :  { %v3016_v11 = vpack.i.bf16 %v714_v8, %v757_v9  ;;  %v1032_v9 = vld [vmem:[%s4653_s4 + $0xa8] sm:$0xff] }
 0x20d   :  { %771 = vrot.lane.b32.xlu1 %v760_v1, %s3285_s28 }
 0x20e   :  { %v748_v29 = vpop.permute.xlu1 %747 }
 0x20f   :  { %v752_v34 = vsel %vm61_vm1, %v748_v29, %v750_v0  ;;  %3012 = vrot.lane.b32.xlu0 %v3011_v12, %s3285_s28  ;;  %v1034_v0 = vld [vmem:[%s4653_s4 + $0xb8] sm:$0xff]  ;;  %v2870_v12 = vpack.c.bf16 %v1029_v31, %v1027_v7  ;;  %v1064_v7 = vld [vmem:[%s4653_s4 + $0x1a8] sm:$0xff] }
 0x210   :  { %v759_v52 = vmax.f32 %v714_v8, %v752_v34  ;;  %v2872_v29 = vpack.c.bf16 %v1034_v0, %v1032_v9  ;;  %v1031_v34 = vld [vmem:[%s4653_s4 + $0xa0] sm:$0xff]  ;;  %v1066_v31 = vld [vmem:[%s4653_s4 + $0x1b8] sm:$0xff]  ;;  %v1065_v0 = vld [vmem:[%s4653_s4 + $0x1b0] sm:$0xff] }
 0x211   :  { %v1063_v9 = vld [vmem:[%s4653_s4 + $0x1a0] sm:$0xff] }
 0x212   :  { %v3021_v3 = vpack.i.bf16 %v759_v52, %v713_v13 }
 0x213   :  { %3017 = vrot.lane.b32.xlu0 %v3016_v11, %s3285_s28  ;;  %v712_v11 = vmax.f32 %v619_v53, 0.0  ;;  %v2892_v53 = vpack.c.bf16 %v1054_v49, %v1052_v48  ;;  %v3151_v48 = vld [vmem:[%s4654_s5 + $0x54] ss:$8 sps:$4 sm:$0xff]   ;;  %v3149_v49 = vld [vmem:[%s4654_s5 + $0x50] ss:$8 sps:$4 sm:$0xff]  }
 0x214   :  { %3022 = vrot.lane.b32.xlu1 %v3021_v3, %s3285_s28  ;;  %v1036_v3 = vld [vmem:[%s4653_s4 + $0xc8] sm:$0xff] }
 0x215   :  { %v2876_v16 = vpack.c.bf16 %v1038_v32, %v1036_v3  ;;  %v1072_v3 = vld [vmem:[%s4653_s4 + $0x1e8] sm:$0xff]  ;;  %v1074_v32 = vld [vmem:[%s4653_s4 + $0x1f8] sm:$0xff] }
 0x27d   :  { %v3933_v28 = vpop.permute.xlu0 %767 }
 0x27e   :  { %2502 = vmatmul.mubr.msk.f32.vlgmr.msra.gmra.mrb[8].mxu0 %vm852_vm3, %v3933_v28 }
 0x27f   :  { %2855 = vmatpush1.bf16.msra.mxu0 %v2854_v18  ;;  %1004 = vmatprep.mubr.f32.mxu0 %v3287_v51  ;;  %v3951_v41 = vpop.permute.xlu1 %771  ;;  %v1037_v18 = vld [vmem:[%s4653_s4 + $0xd0] sm:$0xff] }
 0x280   :  { %2857 = vmatprep.subr.bf16.mxu0 %v2856_v19  ;;  %v1040_v19 = vld [vmem:[%s4653_s4 + $0xe8] sm:$0xff]  ;;  %v2878_v22 = vpack.c.bf16 %v1037_v18, %v1035_v17  ;;  %v1071_v17 = vld [vmem:[%s4653_s4 + $0x1e0] sm:$0xff]  ;;  %v1073_v18 = vld [vmem:[%s4653_s4 + $0x1f0] sm:$0xff] }
 0x281   :  { %v3013_v42 = vpop.permute.xlu0 %3012  ;;  %v2880_v24 = vpack.c.bf16 %v1042_v20, %v1040_v19  ;;  %v1076_v19 = vld [vmem:[%s4653_s4 + $0x208] sm:$0xff]  ;;  %v1078_v20 = vld [vmem:[%s4653_s4 + $0x218] sm:$0xff] }
 0x282   :  { %v3015_v45 = vunpack.i.h.bf16 %v3013_v42  ;;  %v3014_v46 = vunpack.i.l.bf16 %v3013_v42  ;;  %2503 = vmatmul.mubr.msk.f32.gmra.mrb[10].mxu0 %vm852_vm3, %v3951_v41  ;;  %v1045_v42 = vld [vmem:[%s4653_s4 + $0x110] sm:$0xff] }
 0x283   :  { %2859 = vmatpush1.bf16.msra.mxu0 %v2858_v36  ;;  %v1044_v36 = vld [vmem:[%s4653_s4 + $0x108] sm:$0xff] }
 0x284   :  { %2861 = vmatprep.subr.bf16.mxu0 %v2860_v37  ;;  %v729_v58 = vsel %vm61_vm1, %v3015_v45, %v3014_v46  ;;  %v736_v63 = vmax.f32 %v708_v6, %v3014_v46  ;;  %v1046_v37 = vld [vmem:[%s4653_s4 + $0x118] sm:$0xff]  ;;  %v2886_v45 = vpack.c.bf16 %v1045_v42, %v1043_v40  ;;  %v2888_v46 = vpack.c.bf16 %v1050_v44, %v1048_v43  ;;  %v1079_v40 = vld [vmem:[%s4653_s4 + $0x220] sm:$0xff]  ;;  %v1081_v42 = vld [vmem:[%s4653_s4 + $0x230] sm:$0xff] }
 0x285   :  { %v3018_v54 = vpop.permute.xlu0 %3017  ;;  %v3985_v57 = vmax.f32 %v707_v50, %v729_v58  ;;  %v2884_v38 = vpack.c.bf16 %v1046_v37, %v1044_v36  ;;  %v1058_v58 = vld [vmem:[%s4653_s4 + $0x178] sm:$0xff]  ;;  %v1080_v36 = vld [vmem:[%s4653_s4 + $0x228] sm:$0xff]  ;;  %v2922_v43 = vpack.c.bf16 %v1081_v42, %v1079_v40 }
 0x286   :  { %v3020_v59 = vunpack.i.h.bf16 %v3018_v54  ;;  %v3019_v60 = vunpack.i.l.bf16 %v3018_v54  ;;  %v3023_v61 = vpop.permute.xlu1 %3022  ;;  %v1051_v54 = vld [vmem:[%s4653_s4 + $0x140] sm:$0xff]  ;;  %v1082_v37 = vld [vmem:[%s4653_s4 + $0x238] sm:$0xff] }
 0x287   :  { %2863 = vmatpush1.bf16.msra.mxu0 %v2862_v47  ;;  %v3025_v30 = vunpack.i.h.bf16 %v3023_v61  ;;  %v3024_v26 = vunpack.i.l.bf16 %v3023_v61  ;;  %v1047_v47 = vld [vmem:[%s4653_s4 + $0x120] sm:$0xff] }
 0x288   :  { %v738_v2 = vmax.f32 %v713_v13, %v3020_v59  ;;  %2865 = vmatprep.subr.bf16.mxu0 %v2864_v25  ;;  %v773_v4 = vsel %vm61_vm1, %v3019_v60, %v3933_v28  ;;  %v1033_v13 = vld [vmem:[%s4653_s4 + $0xb0] sm:$0xff]  ;;  %v2896_v60 = vpack.c.bf16 %v1058_v58, %v1056_v56  ;;  %v1055_v61 = vld [vmem:[%s4653_s4 + $0x160] sm:$0xff] }
 0x289   :  { %v778_v6 = vsel %vm777_vm4, %v736_v63, %v773_v4  ;;  %v774_v8 = vsel %vm61_vm1, %v3025_v30, %v3951_v41  ;;  %v730_v10 = vsel %vm61_vm1, %v3024_v26, %v3020_v59  ;;  %v2874_v14 = vpack.c.bf16 %v1033_v13, %v1031_v34  ;;  %v1049_v25 = vld [vmem:[%s4653_s4 + $0x130] sm:$0xff]  ;;  %v1060_v30 = vld [vmem:[%s4653_s4 + $0x188] sm:$0xff]  ;;  %v1062_v26 = vld [vmem:[%s4653_s4 + $0x198] sm:$0xff] }
 0x28a   :  { %921 = vmatprep.mubr.f32.mxu1 %v778_v6  ;;  %1147 = vmatprep.mubr.f32.mxu0 %v778_v6  ;;  %v3997_v1 = vsel %vm777_vm4, %v738_v2, %v774_v8  ;;  %v4008_v52 = vmax.f32 %v712_v11, %v730_v10  ;;  %v2890_v50 = vpack.c.bf16 %v1049_v25, %v1047_v47  ;;  %v1057_v63 = vld [vmem:[%s4653_s4 + $0x170] sm:$0xff]  ;;  %v1059_v4 = vld [vmem:[%s4653_s4 + $0x180] sm:$0xff]  ;;  %v1068_v10 = vld [vmem:[%s4653_s4 + $0x1c8] sm:$0xff] }
 0x28b   :  { %2867 = vmatpush1.bf16.msra.mxu0 %v2866_v27  ;;  %922 = vmatmul.mubr.f32.vlgmr.msra.gmra.mrb[4].mxu1 %v3985_v57  ;;  %v2894_v59 = vpack.c.bf16 %v1053_v55, %v1051_v54  ;;  %v2898_v27 = vpack.c.bf16 %v1057_v63, %v1055_v61  ;;  %v2900_v2 = vpack.c.bf16 %v1062_v26, %v1060_v30  ;;  %v1070_v11 = vld [vmem:[%s4653_s4 + $0x1d8] sm:$0xff]  ;;  %v1067_v34 = vld [vmem:[%s4653_s4 + $0x1c0] sm:$0xff]  ;;  %v1069_v13 = vld [vmem:[%s4653_s4 + $0x1d0] sm:$0xff] }
 0x28c   :  { %927 = vmatprep.mubr.f32.mxu1 %v3997_v1  ;;  %2869 = vmatprep.subr.bf16.mxu0 %v2868_v5  ;;  %v1061_v5 = vld [vmem:[%s4653_s4 + $0x190] sm:$0xff]  ;;  %v2904_v8 = vpack.c.bf16 %v1066_v31, %v1064_v7  ;;  %v3140_v44 = vld [vmem:[%s4654_s5 + $0x20] ss:$8 sps:$4 sm:$0xff]   ;;  %v3148_v47 = vld [vmem:[%s4654_s5 + $0x44] ss:$8 sps:$4 sm:$0xff]  }
 0x28d   :  { %v2902_v6 = vpack.c.bf16 %v1061_v5, %v1059_v4  ;;  %v3146_v25 = vld [vmem:[%s4654_s5 + $0x40] ss:$8 sps:$4 sm:$0xff]   ;;  %v3157_v54 = vld [vmem:[%s4654_s5 + $0x74] ss:$8 sps:$4 sm:$0xff]   ;;  %v3155_v55 = vld [vmem:[%s4654_s5 + $0x70] ss:$8 sps:$4 sm:$0xff]  }
 0x28e   :  { %v3160_v56 = vld [vmem:[%s4654_s5 + $0x84] ss:$8 sps:$4 sm:$0xff]   ;;  %v3158_v58 = vld [vmem:[%s4654_s5 + $0x80] ss:$8 sps:$4 sm:$0xff]   ;;  %v3169_v30 = vld [vmem:[%s4654_s5 + $0xb4] ss:$8 sps:$4 sm:$0xff]  }
 0x28f   :  { %2871 = vmatpush1.bf16.msra.mxu0 %v2870_v12  ;;  %928 = vmatmul.mubr.f32.gmra.mrb[6].mxu1 %v4008_v52  ;;  %v2906_v12 = vpack.c.bf16 %v1065_v0, %v1063_v9  ;;  %v3166_v61 = vld [vmem:[%s4654_s5 + $0xa4] ss:$8 sps:$4 sm:$0xff]   ;;  %v3164_v63 = vld [vmem:[%s4654_s5 + $0xa0] ss:$8 sps:$4 sm:$0xff]  }
 0x290   :  { %2873 = vmatprep.subr.bf16.mxu0 %v2872_v29  ;;  %v2908_v29 = vpack.c.bf16 %v1070_v11, %v1068_v10  ;;  %v3172_v4 = vld [vmem:[%s4654_s5 + $0xc4] ss:$8 sps:$4 sm:$0xff]   ;;  %v3170_v31 = vld [vmem:[%s4654_s5 + $0xc0] ss:$8 sps:$4 sm:$0xff]  }
 0x291   :  { %v3178_v9 = vld [vmem:[%s4654_s5 + $0xe4] ss:$8 sps:$4 sm:$0xff]   ;;  %v3176_v10 = vld [vmem:[%s4654_s5 + $0xe0] ss:$8 sps:$4 sm:$0xff]  }
 0x293   :  { %2875 = vmatpush1.bf16.msra.mxu0 %v2874_v14  ;;  %v2910_v14 = vpack.c.bf16 %v1069_v13, %v1067_v34 }
 0x294   :  { %2877 = vmatprep.subr.bf16.mxu0 %v2876_v16  ;;  %v2912_v16 = vpack.c.bf16 %v1074_v32, %v1072_v3  ;;  %v3179_v3 = vld [vmem:[%s4654_s5 + $0xf0] ss:$8 sps:$4 sm:$0xff]  }
 0x297   :  { %2879 = vmatpush1.bf16.msra.mxu0 %v2878_v22  ;;  %v2914_v22 = vpack.c.bf16 %v1073_v18, %v1071_v17  ;;  %v3184_v17 = vld [vmem:[%s4654_s5 + $0x104] ss:$8 sps:$4 sm:$0xff]  }
 0x298   :  { %2881 = vmatprep.subr.bf16.mxu0 %v2880_v24  ;;  %v2916_v24 = vpack.c.bf16 %v1078_v20, %v1076_v19 }
 0x29b   :  { %2883 = vmatpush1.bf16.msra.mxu0 %v2882_v23  ;;  %v2918_v23 = vpack.c.bf16 %v1077_v35, %v1075_v33 }
 0x29c   :  { %2885 = vmatprep.subr.bf16.mxu0 %v2884_v38  ;;  %v2920_v38 = vpack.c.bf16 %v1082_v37, %v1080_v36 }
 0x29f   :  { %2887 = vmatpush1.bf16.msra.mxu0 %v2886_v45  ;;  %v3145_v45 = vld [vmem:[%s4654_s5 + $0x34] ss:$8 sps:$4 sm:$0xff]  }
 0x2a0   :  { %2889 = vmatprep.subr.bf16.mxu0 %v2888_v46  ;;  %v3143_v46 = vld [vmem:[%s4654_s5 + $0x30] ss:$8 sps:$4 sm:$0xff]  }
 0x2a3   :  { %2891 = vmatpush1.bf16.msra.mxu0 %v2890_v50  ;;  %v3154_v50 = vld [vmem:[%s4654_s5 + $0x64] ss:$8 sps:$4 sm:$0xff]  }
 0x2a4   :  { %2893 = vmatprep.subr.bf16.mxu0 %v2892_v53  ;;  %v3152_v53 = vld [vmem:[%s4654_s5 + $0x60] ss:$8 sps:$4 sm:$0xff]  }
 0x2a7   :  { %2895 = vmatpush1.bf16.msra.mxu0 %v2894_v59  ;;  %v3163_v59 = vld [vmem:[%s4654_s5 + $0x94] ss:$8 sps:$4 sm:$0xff]  }
 0x2a8   :  { %2897 = vmatprep.subr.bf16.mxu0 %v2896_v60  ;;  %v3161_v60 = vld [vmem:[%s4654_s5 + $0x90] ss:$8 sps:$4 sm:$0xff]  }
 0x2ab   :  { %2899 = vmatpush1.bf16.msra.mxu0 %v2898_v27 }
 0x2ac   :  { %2901 = vmatprep.subr.bf16.mxu0 %v2900_v2  ;;  %v3167_v2 = vld [vmem:[%s4654_s5 + $0xb0] ss:$8 sps:$4 sm:$0xff]  }
 0x2af   :  { %2903 = vmatpush1.bf16.msra.mxu0 %v2902_v6  ;;  %v3175_v6 = vld [vmem:[%s4654_s5 + $0xd4] ss:$8 sps:$4 sm:$0xff]  }
 0x2b0   :  { %2905 = vmatprep.subr.bf16.mxu0 %v2904_v8  ;;  %v3173_v8 = vld [vmem:[%s4654_s5 + $0xd0] ss:$8 sps:$4 sm:$0xff]  }
 0x2b3   :  { %2907 = vmatpush1.bf16.msra.mxu0 %v2906_v12 }
 0x2b4   :  { %2909 = vmatprep.subr.bf16.mxu0 %v2908_v29  ;;  %v3181_v29 = vld [vmem:[%s4654_s5 + $0xf4] ss:$8 sps:$4 sm:$0xff]  }
 0x2b7   :  { %2911 = vmatpush1.bf16.msra.mxu0 %v2910_v14 }
 0x2b8   :  { %2913 = vmatprep.subr.bf16.mxu0 %v2912_v16 }
 0x2bb   :  { %2915 = vmatpush1.bf16.msra.mxu0 %v2914_v22 }
 0x2bc   :  { %2917 = vmatprep.subr.bf16.mxu0 %v2916_v24 }
 0x2be   :  { %1148 = vmatmul.mubr.f32.vlgmr.msra.gmra.mrb[12].mxu0 %v3985_v57  ;;  %v3134_v57 = vld [vmem:[%s4654_s5] ss:$8 sps:$4 sm:$0xff]  }
 0x2bf   :  { %1153 = vmatprep.mubr.f32.mxu0 %v3997_v1  ;;  %2919 = vmatpush1.bf16.msra.mxu0 %v2918_v23  ;;  %v3136_v1 = vld [vmem:[%s4654_s5 + $0x4] ss:$8 sps:$4 sm:$0xff]  }
 0x2c0   :  { %2921 = vmatprep.subr.bf16.mxu0 %v2920_v38  ;;  %1652 = vmatprep.subr.bf16.mxu1 %v3136_v1 }
 0x2c1   :  { %1653 = vmatpush1.bf16.msra.mxu1 %v3134_v57 }
 0x2c2   :  { %1154 = vmatmul.mubr.f32.gmra.mrb[14].mxu0 %v4008_v52  ;;  %v3139_v52 = vld [vmem:[%s4654_s5 + $0x14] ss:$8 sps:$4 sm:$0xff]  }
 0x2c3   :  { %2923 = vmatpush1.bf16.msra.mxu0 %v2922_v43  ;;  %1224 = vmatprep.mubr.f32.mxu0 %v3287_v51 }
 0x2c4   :  { %1654 = vmatprep.subr.bf16.mxu1 %v3139_v52 }
 0x2c6   :  { %2504 = vmatmul.mubr.msk.f32.vlgmr.msra.gmra.mrb[12].mxu0 %vm852_vm3, %v3933_v28  ;;  %v3137_v28 = vld [vmem:[%s4654_s5 + $0x10] ss:$8 sps:$4 sm:$0xff]  }
 0x2c7   :  { %1230 = vmatprep.mubr.f32.mxu0 %v3287_v51  ;;  %1655 = vmatpush1.bf16.msra.mxu1 %v3137_v28 }
 0x2ca   :  { %2505 = vmatmul.mubr.msk.f32.gmra.mrb[14].mxu0 %vm852_vm3, %v3951_v41  ;;  %v3142_v41 = vld [vmem:[%s4654_s5 + $0x24] ss:$8 sps:$4 sm:$0xff]  }
 0x2cb   :  { %1656 = vmatprep.subr.bf16.mxu1 %v3142_v41  ;;  %2702 = vmatprep.mubr.msk.f32.mxu0 %vm3291_vm12, %v3287_v51 }
 0x2cc   :  { %1657 = vmatpush1.bf16.msra.mxu1 %v3140_v44 }
 0x2cd   :  { %1658 = vmatprep.subr.bf16.mxu1 %v3145_v45 }
 0x2d0   :  { %1659 = vmatpush1.bf16.msra.mxu1 %v3143_v46 }
 0x2d1   :  { %1660 = vmatprep.subr.bf16.mxu1 %v3148_v47 }
 0x2d4   :  { %1661 = vmatpush1.bf16.msra.mxu1 %v3146_v25 }
 0x2d5   :  { %1662 = vmatprep.subr.bf16.mxu1 %v3151_v48 }
 0x2d8   :  { %1663 = vmatpush1.bf16.msra.mxu1 %v3149_v49 }
 0x2d9   :  { %1664 = vmatprep.subr.bf16.mxu1 %v3154_v50 }
 0x2dc   :  { %1665 = vmatpush1.bf16.msra.mxu1 %v3152_v53 }
 0x2dd   :  { %1666 = vmatprep.subr.bf16.mxu1 %v3157_v54 }
 0x2e0   :  { %1667 = vmatpush1.bf16.msra.mxu1 %v3155_v55 }
 0x2e1   :  { %1668 = vmatprep.subr.bf16.mxu1 %v3160_v56 }
 0x2e4   :  { %1669 = vmatpush1.bf16.msra.mxu1 %v3158_v58  ;;  %v1737_v58 = vld [vmem:[%s4656_s7] sm:$0xff] }
 0x2e5   :  { %1670 = vmatprep.subr.bf16.mxu1 %v3163_v59  ;;  %v1738_v59 = vld [vmem:[%s4656_s7 + $0x8] sm:$0xff] }
 0x2e8   :  { %1671 = vmatpush1.bf16.msra.mxu1 %v3161_v60  ;;  %v1739_v60 = vld [vmem:[%s4656_s7 + $0x10] sm:$0xff] }
 0x2e9   :  { %1672 = vmatprep.subr.bf16.mxu1 %v3166_v61  ;;  %v3290_v61 = vmov 0.0|0.0  }
 0x2ea   :  { %2924 = vmatprep.subr.bf16.mxu0 %v3290_v61 }
 0x2ec   :  { %1673 = vmatpush1.bf16.msra.mxu1 %v3164_v63  ;;  %v2925_v63 = vpack.c.bf16 %v1738_v59, %v1737_v58  ;;  %v1366_v59 = vld [vmem:[%s4655_s6] sm:$0x3] }
 0x2ed   :  { %1674 = vmatprep.subr.bf16.mxu1 %v3169_v30  ;;  %v1740_v30 = vld [vmem:[%s4656_s7 + $0x18] sm:$0xff] }
 0x2ee   :  { %2926 = vmatpush3.bf16.msra.mxu0 %v2925_v63  ;;  %v1375_v63 = vrot.slane %v1366_v59, %v193_v39  ;;  %v1826_v39 = vld [vmem:[%s4657_s8 + $0x18] sm:$0xff] }
 0x2ef   :  { %2927 = vmatprep.subr.bf16.mxu0 %v3290_v61 }
 0x2f0   :  { %1675 = vmatpush1.bf16.msra.mxu1 %v3167_v2  ;;  %v1742_v2 = vld [vmem:[%s4656_s7 + $0x28] sm:$0xff] }
 0x2f1   :  { %1676 = vmatprep.subr.bf16.mxu1 %v3172_v4 }
 0x2f4   :  { %1677 = vmatpush1.bf16.msra.mxu1 %v3170_v31 }
 0x2f5   :  { %1678 = vmatprep.subr.bf16.mxu1 %v3175_v6  ;;  %v1745_v6 = vld [vmem:[%s4656_s7 + $0x40] sm:$0xff] }
 0x2f8   :  { %1679 = vmatpush1.bf16.msra.mxu1 %v3173_v8  ;;  %v1746_v8 = vld [vmem:[%s4656_s7 + $0x48] sm:$0xff] }
 0x2f9   :  { %1680 = vmatprep.subr.bf16.mxu1 %v3178_v9  ;;  %v2937_v9 = vpack.c.bf16 %v1746_v8, %v1745_v6 }
 0x2fc   :  { %1681 = vmatpush1.bf16.msra.mxu1 %v3176_v10  ;;  %v1748_v10 = vld [vmem:[%s4656_s7 + $0x58] sm:$0xff] }
 0x2fd   :  { %1682 = vmatprep.subr.bf16.mxu1 %v3181_v29 }
 0x300   :  { %1683 = vmatpush1.bf16.msra.mxu1 %v3179_v3 }
 0x301   :  { %1693 = vmatprep.subr.bf16.mxu1 %v3184_v17 }
 0x351   :  { %v1000_v26 = vpop.f32.mrb[8].mxu0 }
 0x352   :  { %v1002_v27 = vpop.f32.mrb[9].mxu0 }
 0x355   :  { %v1006_v5 = vpop.f32.mrb[10].mxu0 }
 0x356   :  { %v1008_v7 = vpop.f32.mrb[11].mxu0 }
 0x35e   :  { %v923_v0 = vpop.f32.mrb[4].mxu1 }
 0x35f   :  { %v1001_v11 = vadd.f32 %v1000_v26, %v923_v0  ;;  %v925_v12 = vpop.f32.mrb[5].mxu1  ;;  %v2928_v26 = vpack.c.bf16 %v1740_v30, %v1739_v60  ;;  %v1747_v0 = vld [vmem:[%s4656_s7 + $0x50] sm:$0xff]  ;;  %v1371_v60 = vrot.slane %v1366_v59, %v189_v15 }
 0x360   :  { %v1003_v34 = vadd.f32 %v1002_v27, %v925_v12  ;;  %v1741_v27 = vld [vmem:[%s4656_s7 + $0x20] sm:$0xff] }
 0x361   :  { %2929 = vmatpush3.bf16.msra.mxu0 %v2928_v26  ;;  %v2931_v4 = vpack.c.bf16 %v1742_v2, %v1741_v27 }
 0x362   :  { %v929_v13 = vpop.f32.mrb[6].mxu1  ;;  %2930 = vmatprep.subr.bf16.mxu0 %v3290_v61 }
 0x363   :  { %v1007_v32 = vadd.f32 %v1006_v5, %v929_v13  ;;  %v931_v14 = vpop.f32.mrb[7].mxu1  ;;  %v1743_v5 = vld [vmem:[%s4656_s7 + $0x30] sm:$0xff]  ;;  %v3182_v13 = vld [vmem:[%s4654_s5 + $0x100] ss:$8 sps:$4 sm:$0xff]  }
 0x364   :  { %v1009_v16 = vadd.f32 %v1008_v7, %v931_v14  ;;  %v1744_v7 = vld [vmem:[%s4656_s7 + $0x38] sm:$0xff] }
 0x365   :  { %2932 = vmatpush3.bf16.msra.mxu0 %v2931_v4  ;;  %v2934_v31 = vpack.c.bf16 %v1744_v7, %v1743_v5  ;;  %v1823_v5 = vld [vmem:[%s4657_s8] sm:$0xff]  ;;  %v1824_v7 = vld [vmem:[%s4657_s8 + $0x8] sm:$0xff] }
 0x366   :  { %2933 = vmatprep.subr.bf16.mxu0 %v3290_v61  ;;  %v2949_v15 = vpack.c.bf16 %v1824_v7, %v1823_v5 }
 0x369   :  { %2935 = vmatpush3.bf16.msra.mxu0 %v2934_v31 }
 0x36a   :  { %2936 = vmatprep.subr.bf16.mxu0 %v3290_v61 }
 0x36d   :  { %2938 = vmatpush3.bf16.msra.mxu0 %v2937_v9 }
 0x36e   :  { %2939 = vmatprep.subr.bf16.mxu0 %v3290_v61 }
 0x399   :  { %v1226_v18 = vpop.f32.mrb[12].mxu0 }
 0x39a   :  { %v4263_v19 = vmax.f32 %v1001_v11, %v1226_v18  ;;  %v1228_v20 = vpop.f32.mrb[13].mxu0  ;;  %v2940_v11 = vpack.c.bf16 %v1748_v10, %v1747_v0  ;;  %v3185_v18 = vld [vmem:[%s4654_s5 + $0x110] ss:$8 sps:$4 sm:$0xff]   ;;  %v2952_v0 = vpack.c.bf16 %v1826_v39, %v1825_v21  ;;  %v1827_v10 = vld [vmem:[%s4657_s8 + $0x20] sm:$0xff] }
 0x39b   :  { %v4265_v22 = vmax.f32 %v1003_v34, %v1228_v20 }
 0x39c   :  { %v1293_v33 = vrot.slane %v4263_v19, 4  ;;  %v1280_v37 = vrot.slane %v4263_v19, 2  ;;  %vm1241_vm8 = vcmp.ne.f32.partialorder %v4263_v19, 0.0  ;;  %2941 = vmatpush3.bf16.msra.mxu0 %v2940_v11  ;;  %v1308_v3 = vpack.c.bf16 %v4263_v19, %v4263_v19  ;;  %v3190_v19 = vld [vmem:[%s4654_s5 + $0x124] ss:$8 sps:$4 sm:$0xff]  }
 0x39d   :  { %vm1242_vm5 = vcmp.ne.f32.partialorder %v4265_v22, 0.0  ;;  %v1232_v24 = vpop.f32.mrb[14].mxu0  ;;  %v1296_v38 = vrot.slane %v4265_v22, 4  ;;  %v1283_v42 = vrot.slane %v4265_v22, 2  ;;  %v1245_v49 = vsel %vm1241_vm8, 1, %v3286_v62  ;;  %2942 = vmatprep.subr.bf16.mxu0 %v3290_v61  ;;  %v1828_v11 = vld [vmem:[%s4657_s8 + $0x28] sm:$0xff] }
 0x39e   :  { %v1239_v35 = vmax.f32 %v1007_v32, %v1232_v24  ;;  %v1234_v36 = vpop.f32.mrb[15].mxu0  ;;  %v1246_v23 = vsel %vm1242_vm5, 1, %v3286_v62  ;;  %v3187_v32 = vld [vmem:[%s4654_s5 + $0x114] ss:$8 sps:$4 sm:$0xff]   ;;  %v3188_v24 = vld [vmem:[%s4654_s5 + $0x120] ss:$8 sps:$4 sm:$0xff]  }
 0x39f   :  { %v1240_v40 = vmax.f32 %v1009_v16, %v1234_v36  ;;  %v1249_v1 = vsel %vm777_vm4, %v1246_v23, 0  ;;  %v3196_v36 = vld [vmem:[%s4654_s5 + $0x144] ss:$8 sps:$4 sm:$0xff]   ;;  %v3199_v23 = vld [vmem:[%s4654_s5 + $0x154] ss:$8 sps:$4 sm:$0xff]  }
 0x3a0   :  { %vm1243_vm9 = vcmp.ne.f32.partialorder %v1239_v35, 0.0  ;;  %v1281_v43 = vrot.slane %v1239_v35, 2  ;;  %v1294_v57 = vrot.slane %v1239_v35, 4  ;;  %v1254_v54 = vadd.s32 %v1249_v1, %v1245_v49  ;;  %v3191_v35 = vld [vmem:[%s4654_s5 + $0x130] ss:$8 sps:$4 sm:$0xff]   ;;  %v1749_v49 = vld [vmem:[%s4656_s7 + $0x60] sm:$0xff] }
 0x3a1   :  { %v1247_v52 = vsel %vm1243_vm9, 1, %v3286_v62  ;;  %vm1244_vm10 = vcmp.ne.f32.partialorder %v1240_v40, 0.0  ;;  %v1284_v28 = vrot.slane %v1240_v40, 2  ;;  %v1297_v41 = vrot.slane %v1240_v40, 4  ;;  %v3202_v40 = vld [vmem:[%s4654_s5 + $0x164] ss:$8 sps:$4 sm:$0xff]  }
 0x3a2   :  { %v1248_v44 = vsel %vm1244_vm10, 1, %v3286_v62  ;;  %v1282_v45 = vsel %vm87_vm0, %v1280_v37, %v1281_v43  ;;  %v1295_v46 = vsel %vm1250_vm6, %v1293_v33, %v1294_v57  ;;  %v1251_v47 = vsel %vm1250_vm6, %v1247_v52, 0  ;;  %v3193_v33 = vld [vmem:[%s4654_s5 + $0x134] ss:$8 sps:$4 sm:$0xff]   ;;  %v3194_v37 = vld [vmem:[%s4654_s5 + $0x140] ss:$8 sps:$4 sm:$0xff]  }
 0x3a3   :  { %1286 = vrot.lane.b32.xlu0 %v1282_v45, %s3288_s19  ;;  %v1285_v25 = vsel %vm87_vm0, %v1283_v42, %v1284_v28  ;;  %v1298_v48 = vsel %vm1250_vm6, %v1296_v38, %v1297_v41  ;;  %v1253_v50 = vsel %vm1252_vm7, %v1248_v44, 0  ;;  %v3197_v38 = vld [vmem:[%s4654_s5 + $0x150] ss:$8 sps:$4 sm:$0xff]   ;;  %v3200_v42 = vld [vmem:[%s4654_s5 + $0x160] ss:$8 sps:$4 sm:$0xff]   ;;  %vm1912_vm0 = vcmask 523264  }
 0x3a4   :  { %1288 = vrot.lane.b32.xlu1 %v1285_v25, %s3288_s19  ;;  %v3026_v53 = vpack.i.bf16 %v1298_v48, %v1295_v46  ;;  %v1255_v55 = vadd.s32 %v1253_v50, %v1251_v47  ;;  %v3205_v43 = vld [vmem:[%s4654_s5 + $0x174] ss:$8 sps:$4 sm:$0xff]   ;;  %v3203_v57 = vld [vmem:[%s4654_s5 + $0x170] ss:$8 sps:$4 sm:$0xff]   ;;  %v3208_v1 = vld [vmem:[%s4654_s5 + $0x184] ss:$8 sps:$4 sm:$0xff]  }
 0x3a5   :  { %v3206_v52 = vld [vmem:[%s4654_s5 + $0x180] ss:$8 sps:$4 sm:$0xff]   ;;  %v3211_v28 = vld [vmem:[%s4654_s5 + $0x194] ss:$8 sps:$4 sm:$0xff]   ;;  %v3209_v41 = vld [vmem:[%s4654_s5 + $0x190] ss:$8 sps:$4 sm:$0xff]  }
 0x3a6   :  { %v4286_v56 = vadd.s32 %v1255_v55, %v1254_v54  ;;  %v3214_v44 = vld [vmem:[%s4654_s5 + $0x1a4] ss:$8 sps:$4 sm:$0xff]   ;;  %v3212_v46 = vld [vmem:[%s4654_s5 + $0x1a0] ss:$8 sps:$4 sm:$0xff]   ;;  %v1751_v54 = vld [vmem:[%s4656_s7 + $0x70] sm:$0xff]  ;;  %s3293_s5 = smov [#allocation2]  }
 0x3a7   :  { %3027 = vrot.lane.b32.xlu0 %v3026_v53, %s3289_s20  ;;  %v1750_v50 = vld [vmem:[%s4656_s7 + $0x68] sm:$0xff]  ;;  %v1752_v55 = vld [vmem:[%s4656_s7 + $0x78] sm:$0xff] }
 0x3a8   :  { %v2943_v53 = vpack.c.bf16 %v1750_v50, %v1749_v49  ;;  %v2946_v58 = vpack.c.bf16 %v1752_v55, %v1751_v54  ;;  %v3223_v49 = vld [vmem:[%s4658_s9 + $0x60] sm:$0xff]   ;;  %v3226_v54 = vld [vmem:[%s4658_s9 + $0x28] sm:$0xff]   ;;  %v3227_v55 = vld [vmem:[%s4658_s9 + $0x70] sm:$0xff]   ;;  %v1257_v39 = vand.u32 65535, %v4286_v56 }
 0x3a9   :  { %v3224_v50 = vld [vmem:[%s4658_s9 + $0x20] sm:$0xff]  }
 0x3aa   :  { %2944 = vmatpush3.bf16.msra.mxu0 %v2943_v53  ;;  %v3225_v53 = vld [vmem:[%s4658_s9 + $0x68] sm:$0xff]  }
 0x3ab   :  { %2945 = vmatprep.subr.bf16.mxu0 %v3290_v61 }
 0x3ae   :  { %2947 = vmatpush3.bf16.msra.mxu0 %v2946_v58  ;;  %v3228_v58 = vld [vmem:[%s4658_s9 + $0x30] sm:$0xff]  }
 0x3af   :  { %2948 = vmatprep.subr.bf16.mxu0 %v3290_v61 }
 0x415   :  { %v1287_v12 = vpop.permute.xlu0 %1286 }
 0x416   :  { %v1306_v29 = vsel %vm777_vm4, %v4265_v22, %v1287_v12  ;;  %v1289_v45 = vpop.permute.xlu1 %1288 }
 0x417   :  { %v1309_v34 = vpack.c.bf16 %v1306_v29, %v1306_v29  ;;  %v1290_v47 = vsel %vm777_vm4, %v1287_v12, %v1289_v45  ;;  %v2955_v12 = vpack.c.bf16 %v1828_v11, %v1827_v10  ;;  %v1829_v29 = vld [vmem:[%s4657_s8 + $0x30] sm:$0xff]  ;;  %v3218_v45 = vld [vmem:[%s4658_s9 + $0x8] sm:$0xff]  }
 0x419   :  { %1684 = vmatprep.mubr.bf16.mxu1 %v1309_v34  ;;  %v3028_v14 = vpop.permute.xlu0 %3027  ;;  %v1830_v34 = vld [vmem:[%s4657_s8 + $0x38] sm:$0xff] }
 0x41a   :  { %v3030_v16 = vunpack.i.h.bf16 %v3028_v14  ;;  %v3029_v17 = vunpack.i.l.bf16 %v3028_v14  ;;  %1685 = vmatmul.mubr.bf16.vlgmr.msra.gmra.mrb[8].mxu1 %v1308_v3  ;;  %v1831_v3 = vld [vmem:[%s4657_s8 + $0x40] sm:$0xff] }
 0x41b   :  { %1694 = vmatpush1.bf16.msra.mxu1 %v3182_v13  ;;  %v2958_v13 = vpack.c.bf16 %v1830_v34, %v1829_v29 }
 0x41c   :  { %v1303_v20 = vsel %vm852_vm3, %v3029_v17, %v3030_v16  ;;  %1695 = vmatprep.subr.bf16.mxu1 %v3187_v32  ;;  %v1307_v25 = vsel %vm852_vm3, %v1290_v47, %v3029_v17  ;;  %v1832_v32 = vld [vmem:[%s4657_s8 + $0x48] sm:$0xff]  ;;  %v1833_v16 = vld [vmem:[%s4657_s8 + $0x50] sm:$0xff]  ;;  %v1834_v17 = vld [vmem:[%s4657_s8 + $0x58] sm:$0xff] }
 0x41d   :  { %v1311_v22 = vpack.c.bf16 %v1303_v20, %v1303_v20  ;;  %v1310_v48 = vpack.c.bf16 %v1307_v25, %v1307_v25  ;;  %v2961_v14 = vpack.c.bf16 %v1832_v32, %v1831_v3  ;;  %v1835_v20 = vld [vmem:[%s4657_s8 + $0x60] sm:$0xff]  ;;  %v3220_v47 = vld [vmem:[%s4658_s9 + $0x10] sm:$0xff]   ;;  %v3221_v25 = vld [vmem:[%s4658_s9 + $0x58] sm:$0xff]  }
 0x41f   :  { %1696 = vmatpush1.bf16.msra.mxu1 %v3185_v18  ;;  %2560 = vmatprep.mubr.msk.bf16.mxu1 %vm1648_vm11, %v1311_v22  ;;  %v2964_v18 = vpack.c.bf16 %v1834_v17, %v1833_v16 }
 0x420   :  { %1697 = vmatprep.subr.bf16.mxu1 %v3190_v19  ;;  %v1836_v19 = vld [vmem:[%s4657_s8 + $0x68] sm:$0xff] }
 0x421   :  { %v2967_v22 = vpack.c.bf16 %v1836_v19, %v1835_v20 }
 0x423   :  { %1698 = vmatpush1.bf16.msra.mxu1 %v3188_v24  ;;  %v1837_v24 = vld [vmem:[%s4657_s8 + $0x70] sm:$0xff] }
 0x424   :  { %1699 = vmatprep.subr.bf16.mxu1 %v3193_v33  ;;  %v1838_v33 = vld [vmem:[%s4657_s8 + $0x78] sm:$0xff] }
 0x427   :  { %1700 = vmatpush1.bf16.msra.mxu1 %v3191_v35  ;;  %v2970_v35 = vpack.c.bf16 %v1838_v33, %v1837_v24 }
 0x428   :  { %1701 = vmatprep.subr.bf16.mxu1 %v3196_v36  ;;  %v3247_v36 = vld [vmem:[%s4668_s23] sm:$0xff] }
 0x429   :  { %vm57_vm13 = vcmp.ne.f32.partialorder %v3247_v36, 0.0 }
 0x42b   :  { %1702 = vmatpush1.bf16.msra.mxu1 %v3194_v37  ;;  %v3248_v37 = vld [vmem:[%s4668_s23 + $0x8] sm:$0x3f]  ;;  %s2408_s23 = sshll.u32 %s3293_s5, 4  ;;  %s2409_s23 = int_to_ptr.vmem [resolvable:$true] %s2408_s23 }
 0x42c   :  { %1703 = vmatprep.subr.bf16.mxu1 %v3199_v23  ;;  %vm58_vm14 = vcmp.ne.f32.partialorder %v3248_v37, 0.0  ;;  %v59_v23 = vsel %vm57_vm13, 1, %v3286_v62  ;;  %p3254_p1 = scmp.lt.s32.totalorder %s2409_s23, %s2409_s23 }
 0x42f   :  { %1704 = vmatpush1.bf16.msra.mxu1 %v3197_v38  ;;  %v62_v38 = vsel %vm61_vm1, %v59_v23, 0 }
 0x430   :  { %1705 = vmatprep.subr.bf16.mxu1 %v3202_v40 }
 0x433   :  { %1706 = vmatpush1.bf16.msra.mxu1 %v3200_v42 }
 0x434   :  { %1707 = vmatprep.subr.bf16.mxu1 %v3205_v43 }
 0x437   :  { %1708 = vmatpush1.bf16.msra.mxu1 %v3203_v57 }
 0x438   :  { %1709 = vmatprep.subr.bf16.mxu1 %v3208_v1 }
 0x43b   :  { %1710 = vmatpush1.bf16.msra.mxu1 %v3206_v52 }
 0x43c   :  { %1711 = vmatprep.subr.bf16.mxu1 %v3211_v28  ;;  %v3215_v28 = vld [vmem:[%s4658_s9 + $0x40] sm:$0xff]  }
 0x43f   :  { %1712 = vmatpush1.bf16.msra.mxu1 %v3209_v41  ;;  %v3216_v41 = vld [vmem:[%s4658_s9] sm:$0xff]  }
 0x440   :  { %1713 = vmatprep.subr.bf16.mxu1 %v3214_v44  ;;  %v3217_v44 = vld [vmem:[%s4658_s9 + $0x48] sm:$0xff]  }
 0x443   :  { %1714 = vmatpush1.bf16.msra.mxu1 %v3212_v46  ;;  %v3219_v46 = vld [vmem:[%s4658_s9 + $0x50] sm:$0xff]  }
 0x444   :  { %2630 = vmatprep.subr.bf16.mxu1 %v3215_v28 }
 0x446   :  { %1726 = vmatmul.mubr.bf16.vlgmr.msra.gmra.mrb[8].mxu1 %v1310_v48  ;;  %v3222_v48 = vld [vmem:[%s4658_s9 + $0x18] sm:$0xff]  }
 0x447   :  { %2631 = vmatpush3.bf16.msra.mxu1 %v3216_v41 }
 0x448   :  { %2632 = vmatprep.subr.bf16.mxu1 %v3217_v44 }
 0x44b   :  { %2633 = vmatpush3.bf16.msra.mxu1 %v3218_v45 }
 0x44c   :  { %2634 = vmatprep.subr.bf16.mxu1 %v3219_v46 }
 0x44f   :  { %2635 = vmatpush3.bf16.msra.mxu1 %v3220_v47 }
 0x450   :  { %2636 = vmatprep.subr.bf16.mxu1 %v3221_v25 }
 0x453   :  { %2637 = vmatpush3.bf16.msra.mxu1 %v3222_v48 }
 0x454   :  { %2638 = vmatprep.subr.bf16.mxu1 %v3223_v49 }
 0x457   :  { %2639 = vmatpush3.bf16.msra.mxu1 %v3224_v50 }
 0x458   :  { %2640 = vmatprep.subr.bf16.mxu1 %v3225_v53 }
 0x45b   :  { %2641 = vmatpush3.bf16.msra.mxu1 %v3226_v54 }
 0x45c   :  { %2642 = vmatprep.subr.bf16.mxu1 %v3227_v55 }
 0x45f   :  { %2643 = vmatpush3.bf16.msra.mxu1 %v3228_v58 }
 0x519   :  { %v1727_v30 = vpop.f32.mrb[8].mxu1 }
 0x51a   :  { %v2976_v26 = vadd.f32 %v1727_v30, %v1371_v60  ;;  %v1729_v27 = vpop.f32.mrb[9].mxu1  ;;  %v3230_v30 = vld [vmem:[%s4658_s9 + $0x38] sm:$0xff]  }
 0x51b   :  { %v2977_v2 = vadd.f32 %v1729_v27, %v1375_v63  ;;  %v1731_v4 = vpop.f32.mrb[10].mxu1  ;;  %v3229_v63 = vld [vmem:[%s4658_s9 + $0x78] sm:$0xff]  }
 0x51c   :  { %v1734_v31 = vmax.f32 %v2976_v26, 0.0  ;;  %v1732_v6 = vpop.f32.mrb[11].mxu1  ;;  %2644 = vmatprep.subr.bf16.mxu1 %v3229_v63 }
 0x51d   :  { %v1735_v8 = vmax.f32 %v2977_v2, 0.0  ;;  %2645 = vmatpush3.bf16.msra.mxu1 %v3230_v30 }
 0x51e   :  { %2760 = vmatprep.subr.bf16.mxu1 %v3287_v51 }
 0x51f   :  { %v1736_v9 = vmax.f32 %v1734_v31, %v1735_v8 }
 0x521   :  { %2703 = vmatmul.mubr.f32.vlgmr.msra.gmra.mrb[16].mxu0 %v1736_v9 }
 0x522   :  { %2950 = vmatpush3.bf16.msra.mxu0 %v2949_v15  ;;  %2737 = vmatprep.mubr.msk.f32.mxu0 %vm3291_vm12, %v3287_v51 }
 0x523   :  { %2951 = vmatprep.subr.bf16.mxu0 %v3290_v61 }
 0x526   :  { %2953 = vmatpush3.bf16.msra.mxu0 %v2952_v0  ;;  %v1259_v0 = vcvt.s32.f32 %v1257_v39 }
 0x527   :  { %2954 = vmatprep.subr.bf16.mxu0 %v3290_v61 }
 0x52a   :  { %2956 = vmatpush3.bf16.msra.mxu0 %v2955_v12 }
 0x52b   :  { %2957 = vmatprep.subr.bf16.mxu0 %v3290_v61 }
 0x52e   :  { %2959 = vmatpush3.bf16.msra.mxu0 %v2958_v13 }
 0x52f   :  { %2960 = vmatprep.subr.bf16.mxu0 %v3290_v61 }
 0x532   :  { %2962 = vmatpush3.bf16.msra.mxu0 %v2961_v14 }
 0x533   :  { %2963 = vmatprep.subr.bf16.mxu0 %v3290_v61 }
 0x536   :  { %2965 = vmatpush3.bf16.msra.mxu0 %v2964_v18 }
 0x537   :  { %2966 = vmatprep.subr.bf16.mxu0 %v3290_v61 }
 0x53a   :  { %2968 = vmatpush3.bf16.msra.mxu0 %v2967_v22 }
 0x53b   :  { %2969 = vmatprep.subr.bf16.mxu0 %v3290_v61  ;;  %v60_v61 = vsel %vm58_vm14, 1, %v3286_v62 }
 0x53c   :  { %v64_v40 = vsel %vm63_vm15, %v60_v61, 0  ;;  %v3231_v61 = vld [vmem:[%s4660_s11] sm:$0xff]  }
 0x53d   :  { %v65_v42 = vadd.s32 %v64_v40, %v62_v38  ;;  %v3232_v38 = vld [vmem:[%s4660_s11 + $0x8] sm:$0xff]   ;;  %v3233_v40 = vld [vmem:[%s4660_s11 + $0x10] sm:$0xff]  }
 0x53e   :  { %2971 = vmatpush3.bf16.msra.mxu0 %v2970_v35 }
 0x53f   :  { %2740 = vmatprep.subr.bf16.mxu0 %v3287_v51  ;;  %v67_v43 = vshrl.u32 %v65_v42, 16  ;;  %v66_v1 = vand.u32 65535, %v65_v42  ;;  %v3234_v42 = vld [vmem:[%s4660_s11 + $0x18] sm:$0xff]  }
 0x541   :  { %2738 = vmatmul.mubr.f32.vlgmr.msra.gmra.mrb[18].mxu0 %v1736_v9  ;;  %v69_v57 = vcvt.s32.f32 %v67_v43  ;;  %v68_v52 = vcvt.s32.f32 %v66_v1  ;;  %v1258_v9 = vshrl.u32 %v4286_v56, 16  ;;  %v3235_v43 = vld [vmem:[%s4660_s11 + $0x20] sm:$0xff]  }
 0x542   :  { %2756 = vmatprep.mubr.msk.bf16.mxu0 %vm3291_vm12, %v3287_v51  ;;  %2741 = vmatpush3.bf16.msra.mxu0 %v3231_v61 }
 0x543   :  { %72 = vadd.xlane.f32.xlu0 %v69_v57  ;;  %v1260_v21 = vcvt.s32.f32 %v1258_v9  ;;  %2742 = vmatprep.subr.bf16.mxu0 %v3287_v51  ;;  %v3236_v57 = vld [vmem:[%s4660_s11 + $0x28] sm:$0xff]  }
 0x546   :  { %2743 = vmatpush3.bf16.msra.mxu0 %v3232_v38 }
 0x547   :  { %70 = vadd.xlane.f32.xlu0 %v68_v52  ;;  %2744 = vmatprep.subr.bf16.mxu0 %v3287_v51 }
 0x54a   :  { %2745 = vmatpush3.bf16.msra.mxu0 %v3233_v40 }
 0x54b   :  { %2746 = vmatprep.subr.bf16.mxu0 %v3287_v51 }
 0x54e   :  { %2747 = vmatpush3.bf16.msra.mxu0 %v3234_v42 }
 0x54f   :  { %2748 = vmatprep.subr.bf16.mxu0 %v3287_v51 }
 0x552   :  { %2749 = vmatpush3.bf16.msra.mxu0 %v3235_v43 }
 0x553   :  { %2750 = vmatprep.subr.bf16.mxu0 %v3287_v51 }
 0x556   :  { %2751 = vmatpush3.bf16.msra.mxu0 %v3236_v57 }
 0x557   :  { %2752 = vmatprep.subr.bf16.mxu0 %v3287_v51 }
 0x5d0   :  { %v73_v11 = vpop.xlane.xlu0 %72 }
 0x5d1   :  { %v75_v29 = vcvt.f32.s32 %v73_v11 }
 0x5d3   :  { %v76_v13 = vshll.u32 %v75_v29, 16 }
 0x5d4   :  { %v71_v34 = vpop.xlane.xlu0 %70 }
 0x5d5   :  { %v74_v3 = vcvt.f32.s32 %v71_v34 }
 0x5d7   :  { %v77_v32 = vadd.s32 %v76_v13, %v74_v3 }
 0x5d9   :  { %v78_v14 = vrot.slane %v77_v32, 4 }
 0x5db   :  { %v79_v16 = vadd.s32 %v78_v14, %v77_v32  ;;  %v3239_v32 = vld [vmem:[%s4662_s13] sm:$0xff]   ;;  %v3240_v14 = vld [vmem:[%s4662_s13 + $0x8] sm:$0xff]  }
 0x5dd   :  { %v80_v17 = vrot.slane %v79_v16, 2 }
 0x5df   :  { %v81_v18 = vadd.s32 %v80_v17, %v79_v16  ;;  %v3241_v16 = vld [vmem:[%s4662_s13 + $0x10] sm:$0xff]   ;;  %v3242_v17 = vld [vmem:[%s4662_s13 + $0x18] sm:$0xff]  }
 0x5e1   :  { %v82_v20 = vrot.slane %v81_v18, 1 }
 0x5e3   :  { %v83_v19 = vadd.s32 %v82_v20, %v81_v18  ;;  %v3243_v18 = vld [vmem:[%s4662_s13 + $0x20] sm:$0xff]   ;;  %v3244_v20 = vld [vmem:[%s4662_s13 + $0x28] sm:$0xff]  }
 0x5e5   :  { %2986 = vpush %v83_v19  ;;  %v3245_v19 = vld [vmem:[%s4662_s13 + $0x30] sm:$0xff]  }
 0x5f4   :  { %v1819_v59 = vpop.f32.mrb[16].mxu0 }
 0x5f5   :  { %v2704_v60 = vpop.f32.mrb[17].mxu0 }
 0x614   :  { %v1905_v26 = vpop.f32.mrb[18].mxu0 }
 0x615   :  { %v1909_v27 = vmax.f32 %v1819_v59, %v1905_v26  ;;  %v2739_v2 = vpop.f32.mrb[19].mxu0 }
 0x617   :  { %v1934_v4 = vrot.slane %v1909_v27, 2  ;;  %v1940_v5 = vrot.slane %v1909_v27, 6  ;;  %vm1910_vm1 = vcmp.ne.f32.partialorder %v1909_v27, 0.0  ;;  %v1938_v33 = vrot.slane %v1909_v27, 4 }
 0x618   :  { %v1911_v7 = vsel %vm1910_vm1, 1, %v3286_v62 }
 0x619   :  { %v3031_v31 = vpack.i.bf16 %v1934_v4, %v1940_v5  ;;  %v1913_v6 = vsel %vm1912_vm0, %v1911_v7, 0  ;;  %v3237_v5 = vld [vmem:[%s4660_s11 + $0x30] sm:$0xff]   ;;  %v3238_v7 = vld [vmem:[%s4660_s11 + $0x38] sm:$0xff]  }
 0x61a   :  { %v1915_v8 = vshrl.u32 %v1913_v6, 16  ;;  %v1914_v10 = vand.u32 65535, %v1913_v6  ;;  %2753 = vmatpush3.bf16.msra.mxu0 %v3237_v5  ;;  %v2561_v6 = vld [vmem:[%s4659_s10] ss:$0 sm:$0xff] }
 0x61b   :  { %3032 = vrot.lane.b32.xlu1 %v3031_v31, %s3292_s1  ;;  %2754 = vmatprep.subr.bf16.mxu0 %v3287_v51 }
 0x61c   :  { %v1917_v15 = vcvt.s32.f32 %v1915_v8  ;;  %v1916_v12 = vcvt.s32.f32 %v1914_v10 }
 0x61e   :  { %1920 = vadd.xlane.f32.xlu0 %v1917_v15  ;;  %2755 = vmatpush3.bf16.msra.mxu0 %v3238_v7 }
 0x63f   :  { %1263 = vadd.xlane.f32.xlu1 %v1260_v21 }
 0x643   :  { %1261 = vadd.xlane.f32.xlu1 %v1259_v0 }
 0x647   :  { %1918 = vadd.xlane.f32.xlu1 %v1916_v12 }
 0x68d   :  { %v3033_v56 = vpop.permute.xlu1 %3032 }
 0x68e   :  { %v3035_v22 = vunpack.i.h.bf16 %v3033_v56  ;;  %v3034_v24 = vunpack.i.l.bf16 %v3033_v56  ;;  %v3246_v56 = vld [vmem:[%s4662_s13 + $0x38] sm:$0xff]  }
 0x690   :  { %v1944_v35 = vsel %vm1912_vm0, %v1909_v27, %v3035_v22  ;;  %v1945_v36 = vsel %vm1912_vm0, %v1938_v33, %v3034_v24 }
 0x691   :  { %v1946_v37 = vpack.c.bf16 %v1944_v35, %v1944_v35  ;;  %v1947_v23 = vpack.c.bf16 %v1945_v36, %v1945_v36 }
 0x693   :  { %2115 = vmatprep.mubr.bf16.mxu1 %v1947_v23 }
 0x694   :  { %2116 = vmatmul.mubr.bf16.vlgmr.msra.gmra.mrb[12].mxu1 %v1946_v37 }
 0x695   :  { %2776 = vmatprep.mubr.msk.bf16.mxu1 %vm3291_vm12, %v3287_v51  ;;  %2761 = vmatpush3.bf16.msra.mxu1 %v3239_v32 }
 0x696   :  { %2762 = vmatprep.subr.bf16.mxu1 %v3287_v51 }
 0x699   :  { %2763 = vmatpush3.bf16.msra.mxu1 %v3240_v14 }
 0x69a   :  { %2764 = vmatprep.subr.bf16.mxu1 %v3287_v51 }
 0x69d   :  { %2765 = vmatpush3.bf16.msra.mxu1 %v3241_v16 }
 0x69e   :  { %2766 = vmatprep.subr.bf16.mxu1 %v3287_v51 }
 0x6a1   :  { %2767 = vmatpush3.bf16.msra.mxu1 %v3242_v17 }
 0x6a2   :  { %2768 = vmatprep.subr.bf16.mxu1 %v3287_v51 }
 0x6a5   :  { %2769 = vmatpush3.bf16.msra.mxu1 %v3243_v18 }
 0x6a6   :  { %2770 = vmatprep.subr.bf16.mxu1 %v3287_v51 }
 0x6a9   :  { %2771 = vmatpush3.bf16.msra.mxu1 %v3244_v20 }
 0x6aa   :  { %2772 = vmatprep.subr.bf16.mxu1 %v3287_v51 }
 0x6ab   :  { %v1921_v28 = vpop.xlane.xlu0 %1920 }
 0x6ac   :  { %v1923_v44 = vcvt.f32.s32 %v1921_v28 }
 0x6ad   :  { %2773 = vmatpush3.bf16.msra.mxu1 %v3245_v19 }
 0x6ae   :  { %v1924_v48 = vshll.u32 %v1923_v44, 16  ;;  %2774 = vmatprep.subr.bf16.mxu1 %v3287_v51  ;;  %v2578_v51 = vld [vmem:[%s4661_s12] ss:$0 sm:$0xff]  ;;  %s2987_s12 = spop %2986 }
 0x6b1   :  { %2775 = vmatpush3.bf16.msra.mxu1 %v3246_v56 }
 0x6cc   :  { %v1264_v1 = vpop.xlane.xlu1 %1263 }
 0x6cd   :  { %v1266_v52 = vcvt.f32.s32 %v1264_v1 }
 0x6cf   :  { %v1267_v45 = vshll.u32 %v1266_v52, 16 }
 0x6d0   :  { %v1262_v41 = vpop.xlane.xlu1 %1261 }
 0x6d1   :  { %v1265_v46 = vcvt.f32.s32 %v1262_v41 }
 0x6d3   :  { %v1268_v47 = vadd.s32 %v1267_v45, %v1265_v46 }
 0x6d4   :  { %v1919_v25 = vpop.xlane.xlu1 %1918 }
 0x6d5   :  { %v1269_v49 = vrot.slane %v1268_v47, 4  ;;  %v1922_v50 = vcvt.f32.s32 %v1919_v25 }
 0x6d7   :  { %v1270_v53 = vadd.s32 %v1269_v49, %v1268_v47  ;;  %v1925_v54 = vadd.s32 %v1924_v48, %v1922_v50 }
 0x6d9   :  { %v1926_v55 = vrot.slane %v1925_v54, 4  ;;  %v1271_v58 = vrot.slane %v1270_v53, 2 }
 0x6db   :  { %v1927_v59 = vadd.s32 %v1926_v55, %v1925_v54  ;;  %v1272_v60 = vadd.s32 %v1271_v58, %v1270_v53 }
 0x6dd   :  { %v1273_v63 = vrot.slane %v1272_v60, 1  ;;  %v1928_v30 = vrot.slane %v1927_v59, 2 }
 0x6df   :  { %v1274_v26 = vadd.s32 %v1273_v63, %v1272_v60  ;;  %v1929_v27 = vadd.s32 %v1928_v30, %v1927_v59 }
 0x6e1   :  { %2988 = vpush %v1274_v26  ;;  %v1930_v2 = vrot.slane %v1929_v27, 1 }
 0x6e3   :  { %v1931_v4 = vadd.s32 %v1930_v2, %v1929_v27 }
 0x6e5   :  { %2990 = vpush %v1931_v4  ;;  %v2587_v4 = vld [vmem:[%s4663_s14] ss:$0 sm:$0xff]  ;;  %s3249_s14 = scalar_lea.vmem %s2409_s23, 32 }
 0x6e6   :  { %p3250_p0 = scmp.ne.s32.totalorder %s2409_s23, %s3249_s14  ;;  %p3255_p2 = scmp.lt.s32.totalorder %s3249_s14, %s3249_s14 }
 0x6e8   :  { %p3256_p3 = por %p3255_p2, %p3254_p1 }
 0x6ea   :  { %p3257_p4 = pnand %p3256_p3, %p3250_p0 }
 0x712   :  { %s2989_s0 = spop %2988 }
 0x713   :  { %s2396_s8 = sadd.s32 %s2989_s0, %s2987_s12 }
 0x716   :  { %s2991_s17 = spop %2990 }
 0x717   :  { %s2397_s19 = sadd.s32 %s2991_s17, %s2396_s8 }
 0x767   :  { %v2646_v31 = vpop.f32.mrb[12].mxu1 }
 0x768   :  { %v2647_v8 = vpop.f32.mrb[13].mxu1 }
 0x769   :  { %v2648_v15 = vadd.f32 %v2647_v8, %v2646_v31  ;;  %v2649_v9 = vpop.f32.mrb[14].mxu1 }
 0x76a   :  { %v2650_v21 = vpop.f32.mrb[15].mxu1 }
 0x76b   :  { %v2118_v39 = vadd.f32 %v2648_v15, %v2561_v6 }
 0x76d   :  { %v2123_v0 = vmax.f32 %v2118_v39, 0.0 }
 0x76f   :  { %v2147_v10 = vpack.c.bf16 %v2123_v0, %v2123_v0  ;;  %vm2124_vm3 = vcmp.ne.f32.partialorder %v2123_v0, 0.0 }
 0x770   :  { %v2125_v11 = vsel %vm2124_vm3, 1, %v3286_v62 }
 0x771   :  { %2757 = vmatmul.mubr.bf16.vlgmr.msra.gmra.mrb[20].mxu0 %v2147_v10  ;;  %v2127_v12 = vsel %vm2126_vm2, %v2125_v11, 0 }
 0x772   :  { %v2128_v29 = vand.u32 65535, %v2127_v12  ;;  %v2129_v34 = vshrl.u32 %v2127_v12, 16 }
 0x774   :  { %v2130_v13 = vcvt.s32.f32 %v2128_v29  ;;  %v2131_v3 = vcvt.s32.f32 %v2129_v34 }
 0x776   :  { %2132 = vadd.xlane.f32.xlu1 %v2130_v13  ;;  %2134 = vadd.xlane.f32.xlu0 %v2131_v3 }
 0x803   :  { %v2133_v22 = vpop.xlane.xlu1 %2132  ;;  %v2135_v24 = vpop.xlane.xlu0 %2134 }
 0x804   :  { %v2137_v33 = vcvt.f32.s32 %v2135_v24  ;;  %v2136_v35 = vcvt.f32.s32 %v2133_v22 }
 0x806   :  { %v2138_v36 = vshll.u32 %v2137_v33, 16 }
 0x808   :  { %v2139_v37 = vadd.s32 %v2138_v36, %v2136_v35 }
 0x80a   :  { %v2140_v23 = vrot.slane %v2139_v37, 4 }
 0x80c   :  { %v2141_v61 = vadd.s32 %v2140_v23, %v2139_v37 }
 0x80e   :  { %v2142_v38 = vrot.slane %v2141_v61, 2 }
 0x810   :  { %v2143_v40 = vadd.s32 %v2142_v38, %v2141_v61 }
 0x812   :  { %v2144_v42 = vrot.slane %v2143_v40, 1 }
 0x814   :  { %v2145_v43 = vadd.s32 %v2144_v42, %v2143_v40 }
 0x816   :  { %2992 = vpush %v2145_v43 }
 0x844   :  { %v2253_v57 = vpop.f32.mrb[20].mxu0 }
 0x845   :  { %v2254_v1 = vadd.f32 %v2578_v51, %v2253_v57  ;;  %v2758_v52 = vpop.f32.mrb[21].mxu0 }
 0x846   :  { %v2256_v28 = vpop.f32.mrb[22].mxu0 }
 0x847   :  { %v2259_v41 = vmax.f32 %v2254_v1, 0.0  ;;  %v2759_v44 = vpop.f32.mrb[23].mxu0  ;;  %s2993_s18 = spop %2992 }
 0x848   :  { %s2398_s10 = sadd.s32 %s2993_s18, %s2397_s19 }
 0x849   :  { %vm2260_vm4 = vcmp.ne.f32.partialorder %v2259_v41, 0.0  ;;  %v2282_v45 = vpack.c.bf16 %v2259_v41, %v2259_v41 }
 0x84a   :  { %v2261_v46 = vsel %vm2260_vm4, 1, %v3286_v62 }
 0x84b   :  { %2777 = vmatmul.mubr.bf16.vlgmr.msra.gmra.mrb[16].mxu1 %v2282_v45  ;;  %v2262_v47 = vsel %vm2126_vm2, %v2261_v46, 0 }
 0x84c   :  { %v2264_v25 = vshrl.u32 %v2262_v47, 16  ;;  %v2263_v49 = vand.u32 65535, %v2262_v47 }
 0x84e   :  { %v2266_v48 = vcvt.s32.f32 %v2264_v25  ;;  %v2265_v50 = vcvt.s32.f32 %v2263_v49 }
 0x850   :  { %2269 = vadd.xlane.f32.xlu0 %v2266_v48 }
 0x854   :  { %2267 = vadd.xlane.f32.xlu0 %v2265_v50 }
 0x8dd   :  { %v2270_v53 = vpop.xlane.xlu0 %2269 }
 0x8de   :  { %v2272_v54 = vcvt.f32.s32 %v2270_v53 }
 0x8e0   :  { %v2273_v58 = vshll.u32 %v2272_v54, 16 }
 0x8e1   :  { %v2268_v55 = vpop.xlane.xlu0 %2267 }
 0x8e2   :  { %v2271_v59 = vcvt.f32.s32 %v2268_v55 }
 0x8e4   :  { %v2274_v60 = vadd.s32 %v2273_v58, %v2271_v59 }
 0x8e6   :  { %v2275_v63 = vrot.slane %v2274_v60, 4 }
 0x8e8   :  { %v2276_v30 = vadd.s32 %v2275_v63, %v2274_v60 }
 0x8ea   :  { %v2277_v26 = vrot.slane %v2276_v30, 2 }
 0x8ec   :  { %v2278_v27 = vadd.s32 %v2277_v26, %v2276_v30 }
 0x8ee   :  { %v2279_v62 = vrot.slane %v2278_v27, 1 }
 0x8f0   :  { %v2280_v2 = vadd.s32 %v2279_v62, %v2278_v27 }
 0x8f2   :  { %2994 = vpush %v2280_v2 }
 0x91e   :  { %v2388_v5 = vpop.f32.mrb[16].mxu1 }
 0x91f   :  { %v2389_v7 = vadd.f32 %v2587_v4, %v2388_v5  ;;  %v2778_v31 = vpop.f32.mrb[17].mxu1 }
 0x920   :  { %v2391_v6 = vpop.f32.mrb[18].mxu1 }
 0x921   :  { %v2779_v8 = vpop.f32.mrb[19].mxu1  ;;  %v2394_v15 = vmax.f32 %v2389_v7, 0.0 }
 0x923   :  { %s2995_s11 = spop %2994  ;;  %2395 = vst [vmem:[#allocation2] sm:$0x3] %v2394_v15 }
 0x924   :  { %s2399_s20 = sadd.s32 %s2995_s11, %s2398_s10 }
 0x925   :  { %2401 = sst [smem:[#allocation5]] %s2399_s20 }
 0x926   :  { %3260 = shalt.err (!%p3257_p4)
}
 0x927   :  { %s3261_s22 = scalar_lea.hbm %s4664_s15, 32 }
 0x928   :  { %p3262_p5 = scmp.ne.s32.totalorder %s4664_s15, %s3261_s22  ;;  %p3265_p6 = scmp.lt.u32.totalorder %s3261_s22, %s4664_s15 }
 0x92a   :  { %p3267_p7 = pnand %p3265_p6, %p3262_p5 }
 0x92c   :  { %3270 = shalt.err (!%p3267_p7)
}
 0x92d   :  { %2411 = dma.vmem_to_hbm [thread:$0]  %s2409_s23, 32, %s4664_s15, [#allocation3]  }
 0x92e   :  { %s3271_s26 = scalar_lea.hbm %s4665_s16, 16 }
 0x92f   :  { %p3272_p8 = scmp.ne.s32.totalorder %s4665_s16, %s3271_s26  ;;  %p3275_p9 = scmp.lt.u32.totalorder %s3271_s26, %s4665_s16 }
 0x931   :  { %p3277_p10 = pnand %p3275_p9, %p3272_p8 }
 0x933   :  { %3280 = shalt.err (!%p3277_p10)
}
 0x934   :  { %s3294_s13 = smov [#allocation5]  }
 0x935   :  { %2419 = dma.smem_to_hbm %s3294_s13, 16, %s4665_s16, [#allocation4]  }
 0x936   :  { %3281 = dma.done.wait [#allocation3], 32  }
 0x937   :  { %3282 = vsyncadd [#allocation3], 4294967264 }
 0x938   :  { %3283 = dma.done.wait [#allocation4], 16  }
 0x939   :  { %3284 = vsyncadd [#allocation4], 4294967280 }
 0x93a   :  { %2426 = sfence }
 0x93b   :  { %2427 = vsyncpa [#allocation3], 1 }
 0x93c   :  { %2428 = vsyncpa [#allocation4], 1 }

</bundles_post_ra>
